<compile_context>
chip_gen: v5e
topology: v5e:2x2
jax: 0.10.0
libtpu: 0.0.40
codegen_flags: <defaults>
</compile_context>

<pallas_src>
import jax
import jax.numpy as jnp
from jax.experimental import pallas as pl
from jax.experimental.pallas import tpu as pltpu

VOCAB = 64
D_MODEL = 512          # d_model == Encoder out dim == GLCN in_dim/out_dim (512)
REL_DIM = 6


# ---------------------------------------------------------------------------
# tiling helpers (VMEM-budget aware: pick the biggest divisor tile that fits)
# ---------------------------------------------------------------------------
def _largest_divisor_tile(total, unit, max_rows):
    """Largest divisor of `total` that is a multiple of `unit` and <= max_rows."""
    if total <= unit or total % unit != 0:
        return total
    best = unit
    t = unit
    limit = min(total, max(unit, max_rows))
    while t <= limit:
        if total % t == 0:
            best = t
        t += unit
    return best


def _bn_tile(bn, t, d, budget_bytes=4 * 1024 * 1024):
    """Row tile for the pool+project kernel (fits the [TBN, T, D] f32 block)."""
    per_row = t * d * 4 + t * 4 + d * 4
    return _largest_divisor_tile(bn, 8, budget_bytes // per_row)


def _row_tile(n, d, budget_bytes=4 * 1024 * 1024):
    """Row tile for the GLCN kernel; caps the [TI, N, D] f32 pairwise temp."""
    per_row = n * d * 4 + 2 * n * 4 + 2 * d * 4
    return _largest_divisor_tile(n, 8, budget_bytes // per_row)


# ---------------------------------------------------------------------------
# Kernel A+B (fused): masked mean pooling over T + linear encoder stand-in.
#   x_gcn = ((sum_t m_t * e_t) / len) @ W + b, then * node_mask
# Exact rewrite of project-then-pool while the encoder stand-in is linear.
# ---------------------------------------------------------------------------
def _pool_project_kernel(emb_ref, mask_ref, node_ref, w_ref, b_ref, out_ref):
    emb = emb_ref[...]                                   # [TBN, T, D]  f32
    m = mask_ref[...]                                    # [TBN, T]     f32
    summed = jnp.sum(emb * m[:, :, None], axis=1)        # [TBN, D]
    tlen = jnp.sum(m, axis=1, keepdims=True)             # [TBN, 1]
    tlen = tlen + (tlen == 0.0).astype(jnp.float32)      # avoid div-by-zero (as in torch)
    pooled = summed * pl.reciprocal(tlen, approx=True)   # EUP reciprocal
    proj = jnp.dot(pooled.astype(jnp.bfloat16), w_ref[...],
                   preferred_element_type=jnp.float32) + b_ref[...]
    out_ref[...] = proj * node_ref[...]                  # graph_node_mask.any(-1)


def pool_project(emb, text_mask, node_any, w_bf16, b):
    BN, T, D = emb.shape
    TBN = _bn_tile(BN, T, D)
    return pl.pallas_call(
        _pool_project_kernel,
        out_shape=jax.ShapeDtypeStruct((BN, D), jnp.float32),
        grid=(BN // TBN,),
        in_specs=[
            pl.BlockSpec((TBN, T, D), lambda i: (i, 0, 0)),
            pl.BlockSpec((TBN, T), lambda i: (i, 0)),
            pl.BlockSpec((TBN, 1), lambda i: (i, 0)),
            pl.BlockSpec((D, D), lambda i: (0, 0)),
            pl.BlockSpec((1, D), lambda i: (0, 0)),
        ],
        out_specs=pl.BlockSpec((TBN, D), lambda i: (i, 0)),
        compiler_params=pltpu.CompilerParams(dimension_semantics=("parallel",)),
    )(emb, text_mask, node_any, w_bf16, b)


# ---------------------------------------------------------------------------
# Kernel C: GLCN stand-in -- graph learning (pairwise score -> masked softmax
# soft adjacency) + GCN propagation on the MXU.
# Tiled over (batch, row-tile); boxes_num is scalar-prefetched into SMEM.
# TODO(synk): exact GLCN internals are not in the provided module; this is a
# simplified but shape-equivalent graph-learning + GCN layer.
# ---------------------------------------------------------------------------
def _make_glcn_kernel(ti):
    def kernel(bnum_ref, xf_ref, rel_ref, wl_ref, wg_ref, bg_ref,
               xout_ref, sadj_ref):
        b = pl.program_id(0)
        nvalid = bnum_ref[b]                              # int32 scalar (SMEM)

        row0 = pl.multiple_of(pl.program_id(1) * ti, ti)  # query-row offset
        x_full = xf_ref[0]                                # [N,  D] f32 (all nodes)
        x_rows = xf_ref[0, pl.ds(row0, ti), :]            # [TI, D] f32 (query rows)
        rel = rel_ref[0]                                  # [TI, N] f32 (pre-contracted)
        wl = wl_ref[...]                                  # [1, D]

        # pairwise node-distance features + relation score -> scalar score
        diff = jnp.abs(x_rows[:, None, :] - x_full[None, :, :])      # [TI, N, D]
        score = jnp.sum(diff * wl[None, :, :], axis=-1) + rel        # [TI, N]
        score = jnp.where(score > 0, score, 0.01 * score)            # leaky relu

        # mask columns beyond the number of valid boxes, then row softmax
        col = jax.lax.broadcasted_iota(jnp.int32, score.shape, 1)    # [TI, N]
        score = jnp.where(col < nvalid, score, -1e30)
        score = score - jnp.max(score, axis=-1, keepdims=True)
        e = jnp.exp(score)
        soft_adj = e * pl.reciprocal(jnp.sum(e, axis=-1, keepdims=True), approx=True)
        sadj_ref[...] = soft_adj[None]

        # GCN propagation on the MXU: relu( (soft_adj * init_adj) @ x @ Wg + bg )
        # init_adj is all-ones, so adj == soft_adj.
        agg = jnp.dot(soft_adj.astype(jnp.bfloat16), x_full.astype(jnp.bfloat16),
                      preferred_element_type=jnp.float32)            # [TI, D]
        h = jnp.dot(agg.astype(jnp.bfloat16), wg_ref[...],
                    preferred_element_type=jnp.float32) + bg_ref[...]  # [TI, D]
        xout_ref[...] = jnp.maximum(h, 0.0)[None]
    return kernel


def glcn(x_gcn, rel_score, boxes_num, wl, wg_bf16, bg):
    B, Nn, D = x_gcn.shape
    TI = _row_tile(Nn, D)
    return pl.pallas_call(
        _make_glcn_kernel(TI),
        out_shape=(
            jax.ShapeDtypeStruct((B, Nn, D), jnp.float32),
            jax.ShapeDtypeStruct((B, Nn, Nn), jnp.float32),
        ),
        grid_spec=pltpu.PrefetchScalarGridSpec(
            num_scalar_prefetch=1,                       # boxes_num -> SMEM
            grid=(B, Nn // TI),
            in_specs=[
                pl.BlockSpec((1, Nn, D), lambda b, i, bn: (b, 0, 0)),   # full node set
                pl.BlockSpec((1, TI, Nn), lambda b, i, bn: (b, i, 0)),  # rel scores
                pl.BlockSpec((1, D), lambda b, i, bn: (0, 0)),
                pl.BlockSpec((D, D), lambda b, i, bn: (0, 0)),
                pl.BlockSpec((1, D), lambda b, i, bn: (0, 0)),
            ],
            out_specs=(
                pl.BlockSpec((1, TI, D), lambda b, i, bn: (b, i, 0)),
                pl.BlockSpec((1, TI, Nn), lambda b, i, bn: (b, i, 0)),
            ),
        ),
        compiler_params=pltpu.CompilerParams(
            dimension_semantics=("parallel", "parallel")),
    )(boxes_num, x_gcn, rel_score, wl, wg_bf16, bg)


# ---------------------------------------------------------------------------
# Parameters (deterministic, synthetic) and the PICK forward wrapper.
# ---------------------------------------------------------------------------
def init_params(key):
    ks = jax.random.split(key, 5)
    return {
        "emb":     jax.random.normal(ks[0], (VOCAB, D_MODEL), jnp.float32) * 0.02,
        "w_enc":   jax.random.normal(ks[1], (D_MODEL, D_MODEL), jnp.float32) * 0.02,
        "b_enc":   jnp.zeros((1, D_MODEL), jnp.float32),
        "w_learn": jax.random.normal(ks[2], (1, D_MODEL), jnp.float32) * 0.02,
        "w_rel":   jax.random.normal(ks[3], (1, REL_DIM), jnp.float32) * 0.02,
        "w_gcn":   jax.random.normal(ks[4], (D_MODEL, D_MODEL), jnp.float32) * 0.02,
        "b_gcn":   jnp.zeros((1, D_MODEL), jnp.float32),
    }


def pick_forward(params, whole_image, relation_features, text_segments, text_length,
                 mask, boxes_coordinate, iob_tags_label):
    B, Nn, T = mask.shape
    D = params["emb"].shape[1]

    # word embedding lookup (glue: gather)
    text_emb = params["emb"][text_segments]                       # [B, N, T, D]

    # compute_mask (exact semantics of PICK.compute_mask)
    m = mask.reshape(B * Nn, T)
    mask_sum = m.sum(axis=-1)
    graph_node_mask = (mask_sum != 0)[:, None]                    # [BN, 1]
    graph_node_mask_full = jnp.broadcast_to(graph_node_mask, (B * Nn, T))
    src_key_padding_mask = jnp.logical_not(m.astype(bool)) & graph_node_mask_full

    # text_mask = not(src_key_padding_mask); node mask = graph_node_mask.any(-1)
    text_mask = jnp.logical_not(src_key_padding_mask).astype(jnp.float32)        # [BN, T]
    node_any = jnp.any(graph_node_mask_full, axis=-1, keepdims=True).astype(jnp.float32)

    # TODO(synk): PICK's Encoder (ResNet over whole_image, ROI pooling over
    # boxes_coordinate, Transformer w/ src_key_padding_mask) is not defined in the
    # provided module; stand-in = linear projection, algebraically fused with the
    # masked mean pooling (aggregate_avg_pooling) in one Pallas kernel.
    emb = text_emb.reshape(B * Nn, T, D)
    x_gcn = pool_project(emb, text_mask, node_any,
                         params["w_enc"].astype(jnp.bfloat16), params["b_enc"])

    # pre-contract relation features to a lane-dense [B, N, N] score (glue)
    rel_score = jnp.sum(
        relation_features.astype(jnp.float32) * params["w_rel"].reshape(1, 1, 1, REL_DIM),
        axis=-1)                                                   # [B, N, N]

    boxes_num = mask[:, :, 0].sum(axis=1).astype(jnp.int32)        # [B]
    x_gcn = x_gcn.reshape(B, Nn, D)

    # graph learning + GCN (Pallas kernel C)
    x_gcn, soft_adj = glcn(x_gcn, rel_score, boxes_num,
                           params["w_learn"], params["w_gcn"].astype(jnp.bfloat16),
                           params["b_gcn"])

    # init_adj is all-ones, so adj = soft_adj * init_adj == soft_adj.
    adj = soft_adj
    # graph-learning loss (simplified): mean of squared soft adjacency (tiny glue reduce)
    gl_loss = (jnp.sum(soft_adj * soft_adj) / (B * Nn * Nn)).reshape(1, 1)
    return x_gcn, soft_adj, adj, gl_loss


if __name__ == "__main__":
    B, Nn, T = 2, 4, 8
    H = W = 16

    key = jax.random.PRNGKey(0)
    k_par, k_inp = jax.random.split(key)
    params = init_params(k_par)

    ks = jax.random.split(k_inp, 5)
    whole_image = jax.random.normal(ks[0], (B, 3, H, W), jnp.float32)      # NCHW
    relation_features = jax.random.normal(ks[1], (B, Nn, Nn, REL_DIM), jnp.float32)
    text_segments = jax.random.randint(ks[2], (B, Nn, T), 0, VOCAB)
    text_length = jnp.array([[8, 5, 3, 0], [6, 8, 2, 0]], dtype=jnp.int32)  # node 3 empty
    t_idx = jnp.arange(T)[None, None, :]
    mask = (t_idx < text_length[:, :, None]).astype(jnp.int32)             # [B, N, T]
    boxes_coordinate = jax.random.normal(ks[3], (B, Nn, 8), jnp.float32)
    iob_tags_label = jax.random.randint(ks[4], (B, Nn, T), 0, 5)

    x_gcn, soft_adj, adj, gl_loss = pick_forward(
        params, whole_image, relation_features, text_segments, text_length,
        mask, boxes_coordinate, iob_tags_label)

    jax.block_until_ready((x_gcn, soft_adj, adj, gl_loss))
    assert x_gcn.shape == (B, Nn, D_MODEL)
    assert soft_adj.shape == (B, Nn, Nn)
    assert adj.shape == (B, Nn, Nn)
    assert gl_loss.shape == (1, 1)
    print("KERNEL_OK")
</pallas_src>

<mosaic_0001>
module attributes {stable_mosaic.version = 11 : i64} {
  func.func @_pool_project_kernel(%arg0: i32, %arg1: memref<8x8x512xf32, #tpu.memory_space<vmem>>, %arg2: memref<8x8xf32, #tpu.memory_space<vmem>>, %arg3: memref<8x1xf32, #tpu.memory_space<vmem>>, %arg4: memref<512x512xbf16, #tpu.memory_space<vmem>>, %arg5: memref<1x512xf32, #tpu.memory_space<vmem>>, %arg6: memref<8x512xf32, #tpu.memory_space<vmem>>) attributes {dimension_semantics = [#tpu.dimension_semantics<parallel>], iteration_bounds = array<i64: 1>, scalar_prefetch = 0 : i64, scratch_operands = 0 : i64, tpu.core_type = #tpu.core_type<tc>, window_params = [{transform_indices = @transform_0, window_bounds = array<i64: 8, 8, 512>}, {transform_indices = @transform_1, window_bounds = array<i64: 8, 8>}, {transform_indices = @transform_2, window_bounds = array<i64: 8, 1>}, {pipeline_mode = #tpu.pipeline_mode<synchronous>, transform_indices = @transform_3, window_bounds = array<i64: 512, 512>}, {pipeline_mode = #tpu.pipeline_mode<synchronous>, transform_indices = @transform_4, window_bounds = array<i64: 1, 512>}, {transform_indices = @transform_5, window_bounds = array<i64: 8, 512>}]} {
    %c0 = arith.constant 0 : index
    %c0_0 = arith.constant 0 : index
    %c0_1 = arith.constant 0 : index
    %0 = vector.load %arg1[%c0, %c0_0, %c0_1] : memref<8x8x512xf32, #tpu.memory_space<vmem>>, vector<8x8x512xf32>
    %c0_2 = arith.constant 0 : index
    %c0_3 = arith.constant 0 : index
    %1 = vector.load %arg2[%c0_2, %c0_3] : memref<8x8xf32, #tpu.memory_space<vmem>>, vector<8x8xf32>
    %2 = vector.shape_cast %1 : vector<8x8xf32> to vector<8x8x1xf32>
    %3 = vector.broadcast %2 : vector<8x8x1xf32> to vector<8x8x512xf32>
    %4 = arith.mulf %0, %3 : vector<8x8x512xf32>
    %cst = arith.constant dense<0.000000e+00> : vector<8x512xf32>
    %5 = vector.multi_reduction <add>, %4, %cst [1] : vector<8x8x512xf32> to vector<8x512xf32>
    %cst_4 = arith.constant dense<0.000000e+00> : vector<8xf32>
    %6 = vector.multi_reduction <add>, %1, %cst_4 [1] : vector<8x8xf32> to vector<8xf32>
    %7 = vector.shape_cast %6 : vector<8xf32> to vector<8x1xf32>
    %cst_5 = arith.constant 0.000000e+00 : f32
    %8 = vector.broadcast %cst_5 : f32 to vector<8x1xf32>
    %9 = arith.cmpf oeq, %7, %8 : vector<8x1xf32>
    %10 = arith.extui %9 : vector<8x1xi1> to vector<8x1xi32>
    %11 = arith.sitofp %10 : vector<8x1xi32> to vector<8x1xf32>
    %12 = arith.addf %7, %11 : vector<8x1xf32>
    %13 = tpu.reciprocal %12 {approx = true} : vector<8x1xf32> -> vector<8x1xf32>
    %14 = vector.broadcast %13 : vector<8x1xf32> to vector<8x512xf32>
    %15 = arith.mulf %5, %14 : vector<8x512xf32>
    %16 = arith.truncf %15 : vector<8x512xf32> to vector<8x512xbf16>
    %c0_6 = arith.constant 0 : index
    %c0_7 = arith.constant 0 : index
    %17 = vector.load %arg4[%c0_6, %c0_7] : memref<512x512xbf16, #tpu.memory_space<vmem>>, vector<512x512xbf16>
    %cst_8 = arith.constant dense<0.000000e+00> : vector<8x512xf32>
    %18 = tpu.matmul %16, %17, %cst_8 {dimension_numbers = #tpu.dot_dimension_numbers<[1], [0], [0], [1], [0, 0, 1, 1], [], []>} : vector<8x512xbf16>, vector<512x512xbf16>, vector<8x512xf32> -> vector<8x512xf32>
    %c0_9 = arith.constant 0 : index
    %c0_10 = arith.constant 0 : index
    %19 = vector.load %arg5[%c0_9, %c0_10] : memref<1x512xf32, #tpu.memory_space<vmem>>, vector<1x512xf32>
    %20 = vector.broadcast %19 : vector<1x512xf32> to vector<8x512xf32>
    %21 = arith.addf %18, %20 : vector<8x512xf32>
    %c0_11 = arith.constant 0 : index
    %c0_12 = arith.constant 0 : index
    %22 = vector.load %arg3[%c0_11, %c0_12] : memref<8x1xf32, #tpu.memory_space<vmem>>, vector<8x1xf32>
    %23 = vector.broadcast %22 : vector<8x1xf32> to vector<8x512xf32>
    %24 = arith.mulf %21, %23 : vector<8x512xf32>
    %c0_13 = arith.constant 0 : index
    %c0_14 = arith.constant 0 : index
    %25 = vector.load %arg6[%c0_13, %c0_14] : memref<8x512xf32, #tpu.memory_space<vmem>>, vector<8x512xf32>
    tpu.vector_store %arg6[%c0_13, %c0_14], %24 {strides = array<i32>} : memref<8x512xf32, #tpu.memory_space<vmem>>, vector<8x512xf32>,
    return
  }
  func.func @transform_0(%arg0: i32) -> (i32, i32, i32) {
    %c0_i32 = arith.constant 0 : i32
    %c0_i32_0 = arith.constant 0 : i32
    %c0_i32_1 = arith.constant 0 : i32
    return %arg0, %c0_i32, %c0_i32_0 : i32, i32, i32
  }
  func.func @transform_1(%arg0: i32) -> (i32, i32) {
    %c0_i32 = arith.constant 0 : i32
    %c0_i32_0 = arith.constant 0 : i32
    return %arg0, %c0_i32 : i32, i32
  }
  func.func @transform_2(%arg0: i32) -> (i32, i32) {
    %c0_i32 = arith.constant 0 : i32
    %c0_i32_0 = arith.constant 0 : i32
    return %arg0, %c0_i32 : i32, i32
  }
  func.func @transform_3(%arg0: i32) -> (i32, i32) {
    %c0_i32 = arith.constant 0 : i32
    %c0_i32_0 = arith.constant 0 : i32
    %c0_i32_1 = arith.constant 0 : i32
    return %c0_i32, %c0_i32_0 : i32, i32
  }
  func.func @transform_4(%arg0: i32) -> (i32, i32) {
    %c0_i32 = arith.constant 0 : i32
    %c0_i32_0 = arith.constant 0 : i32
    %c0_i32_1 = arith.constant 0 : i32
    return %c0_i32, %c0_i32_0 : i32, i32
  }
  func.func @transform_5(%arg0: i32) -> (i32, i32) {
    %c0_i32 = arith.constant 0 : i32
    %c0_i32_0 = arith.constant 0 : i32
    return %arg0, %c0_i32 : i32, i32
  }
}

</mosaic_0001>

<bundles_post_ra>
// kernel: tpu_custom_call.1
= control target key start
LH: loop header
LB: loop body
LE: loop exit
PB: predicated region body
PF: predicated region fallthrough
CT: control target
= control target key end

     0   :  { %10 = vsyncpa [#allocation3], 0  ;;  %s3107_s0 = inlined_call_operand.hbm [shape: f32[8,8,512], index: 0, kind: input, shape index: {}]   ;;  %s3108_s1 = inlined_call_operand.vmem [shape: f32[8,8], index: 1, kind: input, shape index: {}]   ;;  %s3109_s2 = inlined_call_operand.vmem [shape: f32[8,1], index: 2, kind: input, shape index: {}]   ;;  %s3110_s3 = inlined_call_operand.hbm [shape: bf16[512,512], index: 3, kind: input, shape index: {}]   ;;  %s3111_s4 = inlined_call_operand.hbm [shape: f32[1,512], index: 4, kind: input, shape index: {}]   ;;  %s3112_s5 = inlined_call_operand.hbm [shape: f32[8,512], index: 5, kind: output, shape index: {}]  }
   0x1   :  { %11 = vsyncpa [#allocation6], 0  ;;  %s34_s20 = sshll.u32 %s3110_s3, 4  ;;  %s35_s20 = int_to_ptr.hbm [resolvable:$true] %s34_s20 }
   0x2   :  { %12 = vsyncpa [#allocation4], 0  ;;  %s2381_s21 = smov [#allocation5]   ;;  %s17_s25 = sshll.u32 %s3107_s0, 4  ;;  %s18_s25 = int_to_ptr.hbm [resolvable:$true] %s17_s25 }
   0x3   :  { %s36_s22 = sshll.u32 %s2381_s21, 4  ;;  %s2382_s26 = smov 256   ;;  %s37_s22 = int_to_ptr.vmem [resolvable:$true] %s36_s22 }
   0x4   :  { %s2383_s27 = smov 16   ;;  %s2384_s28 = smov [#allocation2]  }
   0x5   :  { %42 = dma.hbm_to_vmem [thread:$0]  %s35_s20, 16384, %s37_s22, [#allocation6], %s2382_s26, %s2382_s26, %s2383_s27  }
   0x6   :  { %s19_s29 = sshll.u32 %s2384_s28, 4  ;;  %s2385_s30 = smov 512   ;;  %s20_s29 = int_to_ptr.vmem [resolvable:$true] %s19_s29 }
   0x7   :  { %s2386_s6 = smov 32   ;;  %s48_s8 = sshll.u32 %s3111_s4, 4  ;;  %s49_s8 = int_to_ptr.hbm [resolvable:$true] %s48_s8 }
   0x8   :  { %25 = dma.hbm_to_vmem [thread:$0]  %s18_s25, 4096, %s20_s29, [#allocation3], %s2385_s30, %s2385_s30, %s2386_s6  }
   0x9   :  { %s2387_s9 = smov [#allocation7]  }
   0xa   :  { %s50_s10 = sshll.u32 %s2387_s9, 4  ;;  %s51_s10 = int_to_ptr.vmem [resolvable:$true] %s50_s10 }
   0xb   :  { %53 = dma.hbm_to_vmem [thread:$0]  %s49_s8, 64, %s51_s10, [#allocation6]  }
   0xc   :  { %2375 = dma.done.wait [#allocation3], 4096  }
   0xd   :  { %2376 = vsyncadd [#allocation3], 4294963200 }
   0xe   :  { %2377 = dma.done.wait [#allocation6], 16448  }
   0xf   :  { %2378 = vsyncadd [#allocation6], 4294950848  ;;  %v100_v0 = vlaneseq  ;;  %v98_v2 = vld [vmem:[%s3108_s1] sm:$0xff]  ;;  %vm379_vm0 = vcmask 64512   ;;  %v2164_v13 = vld [vmem:[#allocation5 + $0xec] sm:$0xf0] }
  0x10   :  { %v113_v3 = vperm.slane %v98_v2, 2  ;;  %v106_v4 = vperm.slane %v98_v2, 1  ;;  %v120_v5 = vperm.slane %v98_v2, 3  ;;  %v99_v6 = vperm.slane %v98_v2, 0  ;;  %v1736_v12 = vld [vmem:[#allocation5 + $0xe0] sm:$0xf] }
  0x11   :  { %v101_v1 = vshrl.u32 %v100_v0, 7  ;;  %v127_v7 = vperm.slane %v98_v2, 4  ;;  %v134_v8 = vperm.slane %v98_v2, 5  ;;  %v141_v9 = vperm.slane %v98_v2, 6  ;;  %v1864_v15 = vld [vmem:[#allocation5 + $0x1e0] sm:$0xf] }
  0x12   :  { %v148_v10 = vperm.slane %v98_v2, 7  ;;  %v380_v11 = vsel %vm379_vm0, %v98_v2, 0.0  ;;  %v1737_v14 = vor.u32 %v2164_v13, %v1736_v12  ;;  %v2196_v16 = vld [vmem:[#allocation5 + $0x1ec] sm:$0xf0]  ;;  %v1992_v17 = vld [vmem:[#allocation5 + $0x2e0] sm:$0xf] }
  0x13   :  { %2273 = vset.pattern.permute.xlu1 %v101_v1  ;;  %2272 = vset.pattern.permute.xlu0 %v101_v1  ;;  %v1865_v18 = vor.u32 %v2196_v16, %v1864_v15  ;;  %v2228_v19 = vld [vmem:[#allocation5 + $0x2ec] sm:$0xf0]  ;;  %v2120_v20 = vld [vmem:[#allocation5 + $0x3e0] sm:$0xf]  ;;  %v79_v38 = vld [vmem:[#allocation2 + $0x68] sm:$0xff]  ;;  %vm671_vm2 = vcmask 1041409  }
  0x14   :  { %2274 = vset.pattern.permute.xlu2 %v101_v1  ;;  %v2260_v21 = vld [vmem:[#allocation5 + $0x3ec] sm:$0xf0]  ;;  %1381 = vmatpush.bf16.msra.mxu0 %v1737_v14  ;;  %v1993_v22 = vor.u32 %v2228_v19, %v1992_v17  ;;  %v1720_v25 = vld [vmem:[#allocation5 + $0xc0] sm:$0xf]  ;;  %v81_v40 = vld [vmem:[#allocation2 + $0x78] sm:$0xff]  ;;  %vm674_vm3 = vcmask 1042434  }
  0x15   :  { %v2121_v23 = vor.u32 %v2260_v21, %v2120_v20  ;;  %1394 = vmatpush.bf16.msra.mxu1 %v1865_v18  ;;  %v2160_v26 = vld [vmem:[#allocation5 + $0xcc] sm:$0xf0]  ;;  %v1848_v27 = vld [vmem:[#allocation5 + $0x1c0] sm:$0xf]  ;;  %v75_v47 = vld [vmem:[#allocation2 + $0x48] sm:$0xff]  ;;  %vm677_vm4 = vcmask 1043459  }
  0x16   :  { %1407 = vmatpush.bf16.msra.mxu2 %v1993_v22  ;;  %v1721_v28 = vor.u32 %v2160_v26, %v1720_v25  ;;  %v2192_v29 = vld [vmem:[#allocation5 + $0x1cc] sm:$0xf0]  ;;  %v1976_v30 = vld [vmem:[#allocation5 + $0x2c0] sm:$0xf]  ;;  %v77_v59 = vld [vmem:[#allocation2 + $0x58] sm:$0xff]  ;;  %vm680_vm5 = vcmask 1044484  }
  0x17   :  { %1420 = vmatpush.bf16.msra.mxu3 %v2121_v23  ;;  %v2224_v31 = vld [vmem:[#allocation5 + $0x2cc] sm:$0xf0]  ;;  %v1849_v32 = vor.u32 %v2192_v29, %v1848_v27  ;;  %v2104_v34 = vld [vmem:[#allocation5 + $0x3c0] sm:$0xf]  ;;  %v71_v0 = vld [vmem:[#allocation2 + $0x28] sm:$0xff]  ;;  %vm683_vm6 = vcmask 1045509  }
  0x18   :  { %v1977_v33 = vor.u32 %v2224_v31, %v1976_v30  ;;  %v2256_v35 = vld [vmem:[#allocation5 + $0x3cc] sm:$0xf0]  ;;  %1382 = vmatpush.bf16.msra.mxu0 %v1721_v28  ;;  %v78_v37 = vld [vmem:[#allocation2 + $0x60] sm:$0xff]  ;;  %v73_v2 = vld [vmem:[#allocation2 + $0x38] sm:$0xff]  ;;  %vm686_vm7 = vcmask 1046534   ;;  %vm689_vm8 = vcmask 1047559  }
  0x19   :  { %v2105_v36 = vor.u32 %v2256_v35, %v2104_v34  ;;  %v80_v39 = vld [vmem:[#allocation2 + $0x70] sm:$0xff]  ;;  %1395 = vmatpush.bf16.msra.mxu1 %v1849_v32  ;;  %v1704_v44 = vld [vmem:[#allocation5 + $0xa0] sm:$0xf]  ;;  %s1610_s15 = sshll.u32 %s3112_s5, 4  ;;  %s1611_s15 = int_to_ptr.hbm [resolvable:$true] %s1610_s15 }
  0x1a   :  { %1408 = vmatpush.bf16.msra.mxu2 %v1977_v33  ;;  %v2156_v45 = vld [vmem:[#allocation5 + $0xac] sm:$0xf0]  ;;  %v74_v46 = vld [vmem:[#allocation2 + $0x40] sm:$0xff] }
  0x1b   :  { %118 = vperm.xlu1 %2273, %v113_v3   ;;  %111 = vperm.xlu0 %2272, %v106_v4   ;;  %v1705_v49 = vor.u32 %v2156_v45, %v1704_v44  ;;  %v1832_v50 = vld [vmem:[#allocation5 + $0x1a0] sm:$0xf]  ;;  %v2188_v51 = vld [vmem:[#allocation5 + $0x1ac] sm:$0xf0] }
  0x1c   :  { %125 = vperm.xlu2 %2274, %v120_v5   ;;  %1421 = vmatpush.bf16.msra.mxu3 %v2105_v36  ;;  %v1960_v52 = vld [vmem:[#allocation5 + $0x2a0] sm:$0xf]  ;;  %v76_v53 = vld [vmem:[#allocation2 + $0x50] sm:$0xff]  ;;  %v1833_v57 = vor.u32 %v2188_v51, %v1832_v50 }
  0x1d   :  { %v2220_v58 = vld [vmem:[#allocation5 + $0x2ac] sm:$0xf0]  ;;  %v70_v60 = vld [vmem:[#allocation2 + $0x20] sm:$0xff]  ;;  %1383 = vmatpush.bf16.msra.mxu0 %v1705_v49  ;;  %v85_v49 = vld [vmem:[#allocation2 + $0x98] sm:$0xff] }
  0x1e   :  { %v82_v62 = vld [vmem:[#allocation2 + $0x80] sm:$0xff]  ;;  %v1961_v63 = vor.u32 %v2220_v58, %v1960_v52  ;;  %v72_v1 = vld [vmem:[#allocation2 + $0x30] sm:$0xff]  ;;  %1396 = vmatpush.bf16.msra.mxu1 %v1833_v57 }
  0x1f   :  { %v66_v58 = vld [vmem:[#allocation2] sm:$0xff] }
  0x20   :  { %1409 = vmatpush.bf16.msra.mxu2 %v1961_v63 }
  0x23   :  { %104 = vperm.xlu1 %2273, %v99_v6  }
  0x24   :  { %132 = vperm.xlu2 %2274, %v127_v7  }
  0x2b   :  { %139 = vperm.xlu1 %2273, %v134_v8  }
  0x2c   :  { %146 = vperm.xlu2 %2274, %v141_v9  }
  0x33   :  { %153 = vperm.xlu1 %2273, %v148_v10  }
  0x45   :  { %381 = vadd.xlane.f32.xlu0 %v380_v11 }
  0x76   :  { %v126_v24 = vpop.permute.xlu2 %125 }
  0x77   :  { %v167_v41 = vmul.f32 %v126_v24, %v78_v37  ;;  %v168_v42 = vmul.f32 %v126_v24, %v79_v38  ;;  %v169_v43 = vmul.f32 %v126_v24, %v80_v39  ;;  %v170_v48 = vmul.f32 %v126_v24, %v81_v40 }
  0x79   :  { %v259_v54 = vrot.slane %v167_v41, 4  ;;  %v265_v55 = vrot.slane %v168_v42, 4  ;;  %v271_v56 = vrot.slane %v169_v43, 4  ;;  %v277_v61 = vrot.slane %v170_v48, 4 }
  0x7b   :  { %v2433_v3 = vadd.f32 %v259_v54, %v167_v41  ;;  %v2437_v7 = vadd.f32 %v265_v55, %v168_v42  ;;  %v2439_v8 = vadd.f32 %v271_v56, %v169_v43  ;;  %v2441_v9 = vadd.f32 %v277_v61, %v170_v48  ;;  %v84_v48 = vld [vmem:[#allocation2 + $0x90] sm:$0xff] }
  0x7c   :  { %v68_v61 = vld [vmem:[#allocation2 + $0x10] sm:$0xff] }
  0x7e   :  { %v2435_v4 = vpop.permute.xlu2 %132 }
  0x7f   :  { %v2444_v10 = vmul.f32 %v2435_v4, %v82_v62  ;;  %v69_v62 = vld [vmem:[#allocation2 + $0x18] sm:$0xff] }
  0x8d   :  { %v119_v5 = vpop.permute.xlu1 %118  ;;  %v112_v6 = vpop.permute.xlu0 %111 }
  0x8e   :  { %v163_v11 = vmul.f32 %v119_v5, %v74_v46  ;;  %v164_v12 = vmul.f32 %v119_v5, %v75_v47  ;;  %v165_v13 = vmul.f32 %v119_v5, %v76_v53  ;;  %v166_v14 = vmul.f32 %v119_v5, %v77_v59  ;;  %v83_v47 = vld [vmem:[#allocation2 + $0x88] sm:$0xff] }
  0x8f   :  { %v159_v15 = vmul.f32 %v112_v6, %v70_v60  ;;  %v160_v16 = vmul.f32 %v112_v6, %v71_v0  ;;  %v161_v17 = vmul.f32 %v112_v6, %v72_v1  ;;  %v162_v18 = vmul.f32 %v112_v6, %v73_v2  ;;  %v67_v60 = vld [vmem:[#allocation2 + $0x8] sm:$0xff] }
  0x90   :  { %v235_v19 = vrot.slane %v163_v11, 4  ;;  %v241_v20 = vrot.slane %v164_v12, 4  ;;  %v247_v21 = vrot.slane %v165_v13, 4  ;;  %v253_v22 = vrot.slane %v166_v14, 4 }
  0x91   :  { %v211_v23 = vrot.slane %v159_v15, 4  ;;  %v217_v24 = vrot.slane %v160_v16, 4  ;;  %v223_v25 = vrot.slane %v161_v17, 4  ;;  %v229_v26 = vrot.slane %v162_v18, 4 }
  0x92   :  { %v236_v27 = vadd.f32 %v235_v19, %v163_v11  ;;  %v242_v28 = vadd.f32 %v241_v20, %v164_v12  ;;  %v248_v29 = vadd.f32 %v247_v21, %v165_v13  ;;  %v254_v30 = vadd.f32 %v253_v22, %v166_v14 }
  0x93   :  { %v212_v31 = vadd.f32 %v211_v23, %v159_v15  ;;  %v218_v32 = vadd.f32 %v217_v24, %v160_v16  ;;  %v224_v33 = vadd.f32 %v223_v25, %v161_v17  ;;  %v230_v34 = vadd.f32 %v229_v26, %v162_v18 }
  0x94   :  { %v237_v35 = vrot.slane %v236_v27, 2  ;;  %v243_v36 = vrot.slane %v242_v28, 2  ;;  %v249_v37 = vrot.slane %v248_v29, 2  ;;  %v255_v38 = vrot.slane %v254_v30, 2 }
  0x95   :  { %v213_v39 = vrot.slane %v212_v31, 2  ;;  %v219_v40 = vrot.slane %v218_v32, 2  ;;  %v225_v41 = vrot.slane %v224_v33, 2  ;;  %v231_v42 = vrot.slane %v230_v34, 2  ;;  %v105_v12 = vpop.permute.xlu1 %104 }
  0x96   :  { %v238_v43 = vadd.f32 %v237_v35, %v236_v27  ;;  %v244_v44 = vadd.f32 %v243_v36, %v242_v28  ;;  %v250_v45 = vadd.f32 %v249_v37, %v248_v29  ;;  %v256_v46 = vadd.f32 %v255_v38, %v254_v30 }
  0x97   :  { %v214_v50 = vadd.f32 %v213_v39, %v212_v31  ;;  %v220_v51 = vadd.f32 %v219_v40, %v218_v32  ;;  %v226_v52 = vadd.f32 %v225_v41, %v224_v33  ;;  %v232_v53 = vadd.f32 %v231_v42, %v230_v34  ;;  %v86_v40 = vld [vmem:[#allocation2 + $0xa0] sm:$0xff]  ;;  %v87_v41 = vld [vmem:[#allocation2 + $0xa8] sm:$0xff] }
  0x98   :  { %v239_v54 = vrot.slane %v238_v43, 1  ;;  %v245_v55 = vrot.slane %v244_v44, 1  ;;  %v251_v56 = vrot.slane %v250_v45, 1  ;;  %v257_v57 = vrot.slane %v256_v46, 1 }
  0x99   :  { %v215_v59 = vrot.slane %v214_v50, 1  ;;  %v2447_v63 = vmul.f32 %v2435_v4, %v83_v47  ;;  %v2450_v0 = vmul.f32 %v2435_v4, %v84_v48  ;;  %v2453_v1 = vmul.f32 %v2435_v4, %v85_v49 }
  0x9a   :  { %v2455_v2 = vadd.f32 %v239_v54, %v238_v43  ;;  %v221_v5 = vrot.slane %v220_v51, 1  ;;  %v227_v6 = vrot.slane %v226_v52, 1  ;;  %v233_v11 = vrot.slane %v232_v53, 1 }
  0x9b   :  { %v2457_v13 = vadd.f32 %v245_v55, %v244_v44  ;;  %v2459_v14 = vadd.f32 %v251_v56, %v250_v45  ;;  %v2461_v15 = vadd.f32 %v257_v57, %v256_v46  ;;  %v2463_v16 = vadd.f32 %v215_v59, %v214_v50  ;;  %v88_v45 = vld [vmem:[#allocation2 + $0xb0] sm:$0xff] }
  0x9c   :  { %3146 = vst [vmem:[#allocation12_spill] sm:$0xff] %v2455_v2  ;;  %v155_v17 = vmul.f32 %v105_v12, %v66_v58  ;;  %v156_v18 = vmul.f32 %v105_v12, %v67_v60  ;;  %v157_v19 = vmul.f32 %v105_v12, %v68_v61  ;;  %v158_v20 = vmul.f32 %v105_v12, %v69_v62  ;;  %v2712_v2 = vld [vmem:[#allocation5 + $0x290] sm:$0xf0] }
  0x9d   :  { %3147 = vst [vmem:[#allocation13_spill] sm:$0xff] %v2457_v13  ;;  %v261_v4 = vrot.slane %v2433_v3, 2  ;;  %v267_v21 = vrot.slane %v2437_v7, 2  ;;  %v273_v22 = vrot.slane %v2439_v8, 2  ;;  %v279_v23 = vrot.slane %v2441_v9, 2  ;;  %v140_v55 = vpop.permute.xlu1 %139 }
  0x9e   :  { %3148 = vst [vmem:[#allocation14_spill] sm:$0xff] %v2459_v14  ;;  %v187_v24 = vrot.slane %v155_v17, 4  ;;  %v193_v25 = vrot.slane %v156_v18, 4  ;;  %v199_v26 = vrot.slane %v157_v19, 4  ;;  %v205_v27 = vrot.slane %v158_v20, 4 }
  0x9f   :  { %3149 = vst [vmem:[#allocation15_spill] sm:$0xff] %v2461_v15  ;;  %v262_v28 = vadd.f32 %v261_v4, %v2433_v3  ;;  %v268_v29 = vadd.f32 %v267_v21, %v2437_v7  ;;  %v274_v30 = vadd.f32 %v273_v22, %v2439_v8  ;;  %v280_v31 = vadd.f32 %v279_v23, %v2441_v9  ;;  %v89_v7 = vld [vmem:[#allocation2 + $0xb8] sm:$0xff]  ;;  %v2577_v15 = vld [vmem:[#allocation5 + $0x2c] sm:$0xf0]  ;;  %v2652_v14 = vld [vmem:[#allocation5 + $0xc4] sm:$0xf] }
  0xa0   :  { %3150 = vst [vmem:[#allocation16_spill] sm:$0xff] %v2463_v16  ;;  %v188_v32 = vadd.f32 %v187_v24, %v155_v17  ;;  %v194_v33 = vadd.f32 %v193_v25, %v156_v18  ;;  %v200_v34 = vadd.f32 %v199_v26, %v157_v19  ;;  %v206_v35 = vadd.f32 %v205_v27, %v158_v20  ;;  %v2686_v13 = vld [vmem:[#allocation5 + $0x1b0] sm:$0xf0]  ;;  %v2714_v16 = vld [vmem:[#allocation5 + $0x384] sm:$0xf] }
  0xa1   :  { %v263_v36 = vrot.slane %v262_v28, 1  ;;  %v269_v37 = vrot.slane %v268_v29, 1  ;;  %v275_v38 = vrot.slane %v274_v30, 1  ;;  %v281_v39 = vrot.slane %v280_v31, 1  ;;  %3189 = vst [vmem:[#allocation55_spill] sm:$0xff] %v2652_v14 }
  0xa2   :  { %v189_v42 = vrot.slane %v188_v32, 2  ;;  %v195_v43 = vrot.slane %v194_v33, 2  ;;  %v201_v44 = vrot.slane %v200_v34, 2  ;;  %v207_v3 = vrot.slane %v206_v35, 2  ;;  %v2778_v14 = vld [vmem:[#allocation5 + $0x30] sm:$0xf0] }
  0xa3   :  { %v2473_v46 = vadd.f32 %v221_v5, %v220_v51  ;;  %v2475_v8 = vadd.f32 %v227_v6, %v226_v52  ;;  %v2477_v9 = vadd.f32 %v233_v11, %v232_v53  ;;  %v2479_v47 = vadd.f32 %v263_v36, %v262_v28  ;;  %3202 = vst [vmem:[#allocation66_spill] sm:$0xff] %v2778_v14 }
  0xa4   :  { %v190_v48 = vadd.f32 %v189_v42, %v188_v32  ;;  %v196_v49 = vadd.f32 %v195_v43, %v194_v33  ;;  %v202_v50 = vadd.f32 %v201_v44, %v200_v34  ;;  %v208_v54 = vadd.f32 %v207_v3, %v206_v35  ;;  %v2088_v42 = vld [vmem:[#allocation5 + $0x3a0] sm:$0xf] }
  0xa5   :  { %3151 = vst [vmem:[#allocation17_spill] sm:$0xff] %v2473_v46  ;;  %v175_v56 = vmul.f32 %v140_v55, %v86_v40  ;;  %v176_v57 = vmul.f32 %v140_v55, %v87_v41  ;;  %v177_v58 = vmul.f32 %v140_v55, %v88_v45  ;;  %v178_v59 = vmul.f32 %v140_v55, %v89_v7  ;;  %v94_v55 = vld [vmem:[#allocation2 + $0xe0] sm:$0xff] }
  0xa6   :  { %3152 = vst [vmem:[#allocation18_spill] sm:$0xff] %v2475_v8  ;;  %v191_v60 = vrot.slane %v190_v48, 1  ;;  %v2481_v61 = vadd.f32 %v269_v37, %v268_v29  ;;  %v2483_v51 = vadd.f32 %v275_v38, %v274_v30  ;;  %v2485_v52 = vadd.f32 %v281_v39, %v280_v31  ;;  %v2654_v8 = vld [vmem:[#allocation5 + $0xd0] sm:$0xf0]  ;;  %v2688_v46 = vld [vmem:[#allocation5 + $0x2a4] sm:$0xf] }
  0xa7   :  { %3153 = vst [vmem:[#allocation19_spill] sm:$0xff] %v2477_v9  ;;  %v307_v53 = vrot.slane %v175_v56, 4  ;;  %v313_v62 = vrot.slane %v176_v57, 4  ;;  %v319_v5 = vrot.slane %v177_v58, 4  ;;  %v325_v6 = vrot.slane %v178_v59, 4 }
  0xa8   :  { %3154 = vst [vmem:[#allocation20_spill] sm:$0xff] %v2479_v47  ;;  %v2487_v11 = vadd.f32 %v191_v60, %v190_v48  ;;  %v197_v12 = vrot.slane %v196_v49, 1  ;;  %v203_v17 = vrot.slane %v202_v50, 1  ;;  %v209_v18 = vrot.slane %v208_v54, 1  ;;  %v154_v48 = vpop.permute.xlu1 %153  ;;  %v2710_v47 = vld [vmem:[#allocation5 + $0x284] sm:$0xf] }
  0xa9   :  { %3155 = vst [vmem:[#allocation21_spill] sm:$0xff] %v2481_v61  ;;  %v308_v19 = vadd.f32 %v307_v53, %v175_v56  ;;  %v314_v20 = vadd.f32 %v313_v62, %v176_v57  ;;  %v320_v4 = vadd.f32 %v319_v5, %v177_v58  ;;  %v326_v21 = vadd.f32 %v325_v6, %v178_v59  ;;  %v95_v56 = vld [vmem:[#allocation2 + $0xe8] sm:$0xff]  ;;  %v96_v57 = vld [vmem:[#allocation2 + $0xf0] sm:$0xff]  ;;  %v2684_v61 = vld [vmem:[#allocation5 + $0x1a4] sm:$0xf] }
  0xaa   :  { %3156 = vst [vmem:[#allocation22_spill] sm:$0xff] %v2483_v51  ;;  %v283_v22 = vrot.slane %v2444_v10, 4  ;;  %v289_v23 = vrot.slane %v2447_v63, 4  ;;  %v295_v24 = vrot.slane %v2450_v0, 4  ;;  %v301_v25 = vrot.slane %v2453_v1, 4 }
  0xab   :  { %3157 = vst [vmem:[#allocation23_spill] sm:$0xff] %v2485_v52  ;;  %v309_v26 = vrot.slane %v308_v19, 2  ;;  %v315_v27 = vrot.slane %v314_v20, 2  ;;  %v321_v28 = vrot.slane %v320_v4, 2  ;;  %v327_v29 = vrot.slane %v326_v21, 2 }
  0xac   :  { %3158 = vst [vmem:[#allocation24_spill] sm:$0xff] %v2487_v11  ;;  %v284_v30 = vadd.f32 %v283_v22, %v2444_v10  ;;  %v290_v31 = vadd.f32 %v289_v23, %v2447_v63  ;;  %v296_v32 = vadd.f32 %v295_v24, %v2450_v0  ;;  %v302_v33 = vadd.f32 %v301_v25, %v2453_v1  ;;  %v2252_v10 = vld [vmem:[#allocation5 + $0x3ac] sm:$0xf0]  ;;  %v2575_v52 = vld [vmem:[#allocation5 + $0x20] sm:$0xf] }
  0xad   :  { %v310_v34 = vadd.f32 %v309_v26, %v308_v19  ;;  %v316_v35 = vadd.f32 %v315_v27, %v314_v20  ;;  %v322_v36 = vadd.f32 %v321_v28, %v320_v4  ;;  %v328_v37 = vadd.f32 %v327_v29, %v326_v21  ;;  %v97_v20 = vld [vmem:[#allocation2 + $0xf8] sm:$0xff]  ;;  %v90_v4 = vld [vmem:[#allocation2 + $0xc0] sm:$0xff]  ;;  %v2633_v51 = vld [vmem:[#allocation5 + $0x1f0] sm:$0xf0]  ;;  %3190 = vst [vmem:[#allocation56_spill] sm:$0xff] %v2654_v8 }
  0xae   :  { %v285_v38 = vrot.slane %v284_v30, 2  ;;  %v291_v39 = vrot.slane %v290_v31, 2  ;;  %v297_v40 = vrot.slane %v296_v32, 2  ;;  %v303_v41 = vrot.slane %v302_v33, 2  ;;  %3185 = vst [vmem:[#allocation51_spill] sm:$0xff] %v2633_v51 }
  0xaf   :  { %v311_v43 = vrot.slane %v310_v34, 1  ;;  %v317_v44 = vrot.slane %v316_v35, 1  ;;  %v323_v3 = vrot.slane %v322_v36, 1  ;;  %v329_v45 = vrot.slane %v328_v37, 1  ;;  %v2732_v11 = vld [vmem:[#allocation5 + $0x170] sm:$0xf0] }
  0xb0   :  { %v286_v7 = vadd.f32 %v285_v38, %v284_v30  ;;  %v2497_v63 = vadd.f32 %v291_v39, %v290_v31  ;;  %v2499_v0 = vadd.f32 %v297_v40, %v296_v32  ;;  %v2501_v1 = vadd.f32 %v303_v41, %v302_v33  ;;  %v2754_v51 = vld [vmem:[#allocation5 + $0x150] sm:$0xf0]  ;;  %v2776_v8 = vld [vmem:[#allocation5 + $0x24] sm:$0xf] }
  0xb1   :  { %v2503_v58 = vadd.f32 %v197_v12, %v196_v49  ;;  %v2505_v59 = vadd.f32 %v203_v17, %v202_v50  ;;  %v2507_v60 = vadd.f32 %v209_v18, %v208_v54  ;;  %v2509_v53 = vadd.f32 %v311_v43, %v310_v34  ;;  %v147_v12 = vpop.permute.xlu2 %146  ;;  %v91_v50 = vld [vmem:[#allocation2 + $0xc8] sm:$0xff]  ;;  %v92_v17 = vld [vmem:[#allocation2 + $0xd0] sm:$0xff]  ;;  %v93_v54 = vld [vmem:[#allocation2 + $0xd8] sm:$0xff]  ;;  %3201 = vst [vmem:[#allocation65_spill] sm:$0xff] %v2776_v8 }
  0xb2   :  { %v2511_v62 = vadd.f32 %v317_v44, %v316_v35  ;;  %v2513_v5 = vadd.f32 %v323_v3, %v322_v36  ;;  %v2515_v6 = vadd.f32 %v329_v45, %v328_v37  ;;  %v287_v19 = vrot.slane %v286_v7, 1 }
  0xb3   :  { %3159 = vst [vmem:[#allocation25_spill] sm:$0xff] %v2503_v58  ;;  %v2089_v21 = vor.u32 %v2252_v10, %v2088_v42  ;;  %v183_v22 = vmul.f32 %v154_v48, %v94_v55  ;;  %v184_v23 = vmul.f32 %v154_v48, %v95_v56  ;;  %v185_v49 = vmul.f32 %v154_v48, %v96_v57  ;;  %v2690_v58 = vld [vmem:[#allocation5 + $0x2b0] sm:$0xf0] }
  0xb4   :  { %3160 = vst [vmem:[#allocation26_spill] sm:$0xff] %v2505_v59  ;;  %v2517_v18 = vadd.f32 %v287_v19, %v286_v7  ;;  %v293_v24 = vrot.slane %v2497_v63, 1  ;;  %v299_v25 = vrot.slane %v2499_v0, 1  ;;  %v305_v26 = vrot.slane %v2501_v1, 1  ;;  %v2672_v59 = vld [vmem:[#allocation5 + $0x3d0] sm:$0xf0] }
  0xb5   :  { %3161 = vst [vmem:[#allocation27_spill] sm:$0xff] %v2507_v60  ;;  %1422 = vmatpush.bf16.msra.mxu3 %v2089_v21  ;;  %v186_v27 = vmul.f32 %v154_v48, %v97_v20  ;;  %v355_v28 = vrot.slane %v183_v22, 4  ;;  %v361_v29 = vrot.slane %v184_v23, 4  ;;  %v367_v30 = vrot.slane %v185_v49, 4 }
  0xb6   :  { %3162 = vst [vmem:[#allocation28_spill] sm:$0xff] %v2509_v53  ;;  %v179_v31 = vmul.f32 %v147_v12, %v90_v4  ;;  %v180_v32 = vmul.f32 %v147_v12, %v91_v50  ;;  %v181_v33 = vmul.f32 %v147_v12, %v92_v17  ;;  %v182_v34 = vmul.f32 %v147_v12, %v93_v54  ;;  %v2152_v12 = vld [vmem:[#allocation5 + $0x8c] sm:$0xf0]  ;;  %v1816_v50 = vld [vmem:[#allocation5 + $0x180] sm:$0xf] }
  0xb7   :  { %3163 = vst [vmem:[#allocation29_spill] sm:$0xff] %v2511_v62  ;;  %v356_v35 = vadd.f32 %v355_v28, %v183_v22  ;;  %v362_v36 = vadd.f32 %v361_v29, %v184_v23  ;;  %v368_v37 = vadd.f32 %v367_v30, %v185_v49  ;;  %v373_v38 = vrot.slane %v186_v27, 4  ;;  %v1688_v49 = vld [vmem:[#allocation5 + $0x80] sm:$0xf]  ;;  %v2184_v17 = vld [vmem:[#allocation5 + $0x18c] sm:$0xf0] }
  0xb8   :  { %3164 = vst [vmem:[#allocation30_spill] sm:$0xff] %v2513_v5  ;;  %v331_v39 = vrot.slane %v179_v31, 4  ;;  %v337_v40 = vrot.slane %v180_v32, 4  ;;  %v343_v41 = vrot.slane %v181_v33, 4  ;;  %v349_v42 = vrot.slane %v182_v34, 4 }
  0xb9   :  { %3165 = vst [vmem:[#allocation31_spill] sm:$0xff] %v2515_v6  ;;  %v357_v43 = vrot.slane %v356_v35, 2  ;;  %v363_v44 = vrot.slane %v362_v36, 2  ;;  %v369_v3 = vrot.slane %v368_v37, 2  ;;  %v374_v45 = vadd.f32 %v373_v38, %v186_v27  ;;  %v2522_v54 = vld [vmem:[#allocation5 + $0x280] sm:$0xf] }
  0xba   :  { %3166 = vst [vmem:[#allocation32_spill] sm:$0xff] %v2517_v18  ;;  %v332_v10 = vadd.f32 %v331_v39, %v179_v31  ;;  %v338_v7 = vadd.f32 %v337_v40, %v180_v32  ;;  %v344_v48 = vadd.f32 %v343_v41, %v181_v33  ;;  %v350_v55 = vadd.f32 %v349_v42, %v182_v34  ;;  %v2216_v31 = vld [vmem:[#allocation5 + $0x28c] sm:$0xf0]  ;;  %v2530_v38 = vld [vmem:[#allocation5 + $0x60] sm:$0xf] }
  0xbb   :  { %v358_v56 = vadd.f32 %v357_v43, %v356_v35  ;;  %v364_v57 = vadd.f32 %v363_v44, %v362_v36  ;;  %v370_v19 = vadd.f32 %v369_v3, %v368_v37  ;;  %v375_v20 = vrot.slane %v374_v45, 2  ;;  %v2526_v36 = vld [vmem:[#allocation5 + $0x380] sm:$0xf]  ;;  %v2528_v37 = vld [vmem:[#allocation5 + $0x38c] sm:$0xf0] }
  0xbc   :  { %v333_v4 = vrot.slane %v332_v10, 2  ;;  %v339_v21 = vrot.slane %v338_v7, 2  ;;  %v345_v22 = vrot.slane %v344_v48, 2  ;;  %v351_v23 = vrot.slane %v350_v55, 2  ;;  %v2532_v39 = vld [vmem:[#allocation5 + $0x6c] sm:$0xf0] }
  0xbd   :  { %v359_v28 = vrot.slane %v358_v56, 1  ;;  %v365_v27 = vrot.slane %v364_v57, 1  ;;  %v371_v29 = vrot.slane %v370_v19, 1  ;;  %v376_v30 = vadd.f32 %v375_v20, %v374_v45  ;;  %v2534_v40 = vld [vmem:[#allocation5 + $0x160] sm:$0xf] }
  0xbe   :  { %v334_v32 = vadd.f32 %v333_v4, %v332_v10  ;;  %v340_v33 = vadd.f32 %v339_v21, %v338_v7  ;;  %v346_v34 = vadd.f32 %v345_v22, %v344_v48  ;;  %v2524_v35 = vadd.f32 %v351_v23, %v350_v55  ;;  %v2536_v41 = vld [vmem:[#allocation5 + $0x16c] sm:$0xf0]  ;;  %v2547_v45 = vld [vmem:[#allocation5 + $0x260] sm:$0xf]  ;;  %v2706_v53 = vld [vmem:[#allocation5 + $0x184] sm:$0xf] }
  0xbf   :  { %v2539_v42 = vadd.f32 %v293_v24, %v2497_v63  ;;  %v2542_v43 = vadd.f32 %v299_v25, %v2499_v0  ;;  %v2545_v44 = vadd.f32 %v305_v26, %v2501_v1  ;;  %v377_v3 = vrot.slane %v376_v30, 1  ;;  %v2549_v10 = vld [vmem:[#allocation5 + $0x26c] sm:$0xf0]  ;;  %v2553_v4 = vld [vmem:[#allocation5 + $0x360] sm:$0xf] }
  0xc0   :  { %v2551_v7 = vadd.f32 %v359_v28, %v358_v56  ;;  %v335_v48 = vrot.slane %v334_v32, 1  ;;  %v341_v55 = vrot.slane %v340_v33, 1  ;;  %v347_v20 = vrot.slane %v346_v34, 1  ;;  %v2555_v63 = vld [vmem:[#allocation5 + $0x36c] sm:$0xf0] }
  0xc1   :  { %3167 = vst [vmem:[#allocation33_spill] sm:$0xff] %v2539_v42  ;;  %v2557_v24 = vld [vmem:[#allocation5 + $0x40] sm:$0xf]  ;;  %v2559_v0 = vld [vmem:[#allocation5 + $0x4c] sm:$0xf0]  ;;  %v353_v26 = vrot.slane %v2524_v35, 1  ;;  %v1689_v21 = vor.u32 %v2152_v12, %v1688_v49  ;;  %v1817_v56 = vor.u32 %v2184_v17, %v1816_v50  ;;  %v1945_v22 = vor.u32 %v2216_v31, %v2522_v54 }
  0xc2   :  { %3168 = vst [vmem:[#allocation34_spill] sm:$0xff] %v2542_v43  ;;  %v2561_v1 = vld [vmem:[#allocation5 + $0x140] sm:$0xf]  ;;  %v2563_v25 = vld [vmem:[#allocation5 + $0x14c] sm:$0xf0]  ;;  %v2579_v9 = vadd.f32 %v365_v27, %v364_v57  ;;  %v2581_v60 = vadd.f32 %v371_v29, %v370_v19  ;;  %v2583_v49 = vadd.f32 %v377_v3, %v376_v30  ;;  %v2585_v12 = vadd.f32 %v335_v48, %v334_v32  ;;  %v382_v29 = vpop.xlane.xlu0 %381 }
  0xc3   :  { %3169 = vst [vmem:[#allocation35_spill] sm:$0xff] %v2545_v44  ;;  %v2567_v23 = vld [vmem:[#allocation5 + $0x240] sm:$0xf]  ;;  %v2569_v28 = vld [vmem:[#allocation5 + $0x24c] sm:$0xf0]  ;;  %1384 = vmatpush.bf16.msra.mxu0 %v1689_v21  ;;  %1397 = vmatpush.bf16.msra.mxu1 %v1817_v56  ;;  %v2073_v57 = vor.u32 %v2528_v37, %v2526_v36  ;;  %v1673_v19 = vor.u32 %v2532_v39, %v2530_v38  ;;  %vm383_vm1 = vcmp.eq.f32.partialorder %v382_v29, 0.0 }
  0xc4   :  { %3170 = vst [vmem:[#allocation36_spill] sm:$0xff] %v2551_v7  ;;  %v2571_v6 = vld [vmem:[#allocation5 + $0x340] sm:$0xf]  ;;  %v2573_v44 = vld [vmem:[#allocation5 + $0x34c] sm:$0xf0]  ;;  %v1801_v27 = vor.u32 %v2536_v41, %v2534_v40  ;;  %v2617_v36 = vadd.f32 %v341_v55, %v340_v33  ;;  %v2619_v37 = vadd.f32 %v347_v20, %v346_v34  ;;  %1410 = vmatpush.bf16.msra.mxu2 %v1945_v22  ;;  %v2388_v62 = vmov 0.0  }
  0xc5   :  { %3171 = vst [vmem:[#allocation37_spill] sm:$0xff] %v2579_v9  ;;  %v2587_v50 = vld [vmem:[#allocation5 + $0x120] sm:$0xf]  ;;  %v2589_v17 = vld [vmem:[#allocation5 + $0x12c] sm:$0xf0]  ;;  %v1929_v38 = vor.u32 %v2549_v10, %v2547_v45  ;;  %v2640_v55 = vadd.f32 %v353_v26, %v2524_v35  ;;  %1423 = vmatpush.bf16.msra.mxu3 %v2073_v57  ;;  %v2057_v45 = vor.u32 %v2555_v63, %v2553_v4  ;;  %v1621_v42 = vsel %vm383_vm1, 1.0, %v2388_v62 }
  0xc6   :  { %3172 = vst [vmem:[#allocation38_spill] sm:$0xff] %v2581_v60  ;;  %v2591_v54 = vld [vmem:[#allocation5 + $0x220] sm:$0xf]  ;;  %v2593_v31 = vld [vmem:[#allocation5 + $0x22c] sm:$0xf0]  ;;  %v386_v4 = vadd.f32 %v1621_v42, %v382_v29  ;;  %v3199_v62 = vor.u32 %v2563_v25, %v2561_v1 }
  0xc7   :  { %3173 = vst [vmem:[#allocation39_spill] sm:$0xff] %v2583_v49  ;;  %v2595_v5 = vld [vmem:[#allocation5 + $0x320] sm:$0xf]  ;;  %v2597_v43 = vld [vmem:[#allocation5 + $0x32c] sm:$0xf0]  ;;  %1385 = vmatpush.bf16.msra.mxu0 %v1673_v19  ;;  %1398 = vmatpush.bf16.msra.mxu1 %v1801_v27 }
  0xc8   :  { %3174 = vst [vmem:[#allocation40_spill] sm:$0xff] %v2585_v12  ;;  %v2605_v30 = vld [vmem:[#allocation5] sm:$0xf]  ;;  %v2607_v32 = vld [vmem:[#allocation5 + $0xc] sm:$0xf0]  ;;  %1411 = vmatpush.bf16.msra.mxu2 %v1929_v38  ;;  %2277 = vrcp.f32 %v386_v4  ;;  %v3198_v4 = vor.u32 %v2559_v0, %v2557_v24  ;;  %v3203_v24 = vor.u32 %v2569_v28, %v2567_v23  ;;  %v3207_v23 = vor.u32 %v2573_v44, %v2571_v6 }
  0xc9   :  { %v2609_v3 = vld [vmem:[#allocation5 + $0x100] sm:$0xf]  ;;  %v2611_v48 = vld [vmem:[#allocation5 + $0x10c] sm:$0xf0]  ;;  %3179 = vst [vmem:[#allocation45_spill] sm:$0xff] %v2617_v36  ;;  %1424 = vmatpush.bf16.msra.mxu3 %v2057_v45  ;;  %v3213_v28 = vor.u32 %v2577_v15, %v2575_v52  ;;  %v3214_v6 = vor.u32 %v2589_v17, %v2587_v50  ;;  %v3217_v15 = vor.u32 %v2593_v31, %v2591_v54 }
  0xca   :  { %3175 = vst [vmem:[#allocation41_spill] sm:$0xff] %v2609_v3  ;;  %v2613_v21 = vld [vmem:[#allocation5 + $0x200] sm:$0xf]  ;;  %v2615_v56 = vld [vmem:[#allocation5 + $0x20c] sm:$0xf0] }
  0xcb   :  { %3176 = vst [vmem:[#allocation42_spill] sm:$0xff] %v2611_v48  ;;  %v2623_v39 = vld [vmem:[#allocation5 + $0x300] sm:$0xf]  ;;  %v2625_v40 = vld [vmem:[#allocation5 + $0x30c] sm:$0xf0]  ;;  %1386 = vmatpush.bf16.msra.mxu0 %v3198_v4  ;;  %1399 = vmatpush.bf16.msra.mxu1 %v3199_v62 }
  0xcc   :  { %3177 = vst [vmem:[#allocation43_spill] sm:$0xff] %v2613_v21  ;;  %v2627_v41 = vld [vmem:[#allocation5 + $0xe4] sm:$0xf]  ;;  %v2629_v49 = vld [vmem:[#allocation5 + $0xf0] sm:$0xf0]  ;;  %1412 = vmatpush.bf16.msra.mxu2 %v3203_v24 }
  0xcd   :  { %3178 = vst [vmem:[#allocation44_spill] sm:$0xff] %v2615_v56  ;;  %v2631_v60 = vld [vmem:[#allocation5 + $0x1e4] sm:$0xf]  ;;  %v2637_v34 = vld [vmem:[#allocation5 + $0x2f0] sm:$0xf0]  ;;  %1425 = vmatpush.bf16.msra.mxu3 %v3207_v23 }
  0xce   :  { %3180 = vst [vmem:[#allocation46_spill] sm:$0xff] %v2619_v37  ;;  %v2635_v33 = vld [vmem:[#allocation5 + $0x2e4] sm:$0xf]  ;;  %v2650_v37 = vld [vmem:[#allocation5 + $0x3f0] sm:$0xf0] }
  0xcf   :  { %3181 = vst [vmem:[#allocation47_spill] sm:$0xff] %v2623_v39  ;;  %v2648_v22 = vld [vmem:[#allocation5 + $0x3e4] sm:$0xf]  ;;  %v2658_v26 = vld [vmem:[#allocation5 + $0x1d0] sm:$0xf0]  ;;  %1387 = vmatpush.bf16.msra.mxu0 %v3213_v28  ;;  %1400 = vmatpush.bf16.msra.mxu1 %v3214_v6  ;;  %v3218_v6 = vor.u32 %v2597_v43, %v2595_v5 }
  0xd0   :  { %3182 = vst [vmem:[#allocation48_spill] sm:$0xff] %v2625_v40  ;;  %v2656_v35 = vld [vmem:[#allocation5 + $0x1c4] sm:$0xf]  ;;  %v2668_v10 = vld [vmem:[#allocation5 + $0x2d0] sm:$0xf0]  ;;  %1413 = vmatpush.bf16.msra.mxu2 %v3217_v15 }
  0xd1   :  { %3183 = vst [vmem:[#allocation49_spill] sm:$0xff] %v2629_v49  ;;  %v2666_v20 = vld [vmem:[#allocation5 + $0x2c4] sm:$0xf]  ;;  %v2676_v36 = vld [vmem:[#allocation5 + $0xb0] sm:$0xf0]  ;;  %1426 = vmatpush.bf16.msra.mxu3 %v3218_v6  ;;  %v3219_v6 = vor.u32 %v2607_v32, %v2605_v30  ;;  %v3221_v54 = vld [vmem:[#allocation41_spill] sm:$0xff] }
  0xd2   :  { %3184 = vst [vmem:[#allocation50_spill] sm:$0xff] %v2631_v60  ;;  %v2674_v9 = vld [vmem:[#allocation5 + $0xa4] sm:$0xf]  ;;  %v2694_v27 = vld [vmem:[#allocation5 + $0x3b0] sm:$0xf0] }
  0xd3   :  { %3186 = vst [vmem:[#allocation52_spill] sm:$0xff] %v2635_v33  ;;  %v2692_v19 = vld [vmem:[#allocation5 + $0x3a4] sm:$0xf]  ;;  %v2698_v57 = vld [vmem:[#allocation5 + $0x90] sm:$0xf0]  ;;  %1388 = vmatpush.bf16.msra.mxu0 %v3219_v6 }
  0xd4   :  { %3187 = vst [vmem:[#allocation53_spill] sm:$0xff] %v2637_v34  ;;  %v2696_v63 = vld [vmem:[#allocation5 + $0x84] sm:$0xf]  ;;  %v2708_v18 = vld [vmem:[#allocation5 + $0x190] sm:$0xf0] }
  0xd5   :  { %3188 = vst [vmem:[#allocation54_spill] sm:$0xff] %v2640_v55  ;;  %v2670_v55 = vld [vmem:[#allocation5 + $0x3c4] sm:$0xf]  ;;  %v2716_v42 = vld [vmem:[#allocation5 + $0x390] sm:$0xf0] }
  0xd6   :  { %3191 = vst [vmem:[#allocation57_spill] sm:$0xff] %v2656_v35  ;;  %v2718_v29 = vld [vmem:[#allocation5 + $0x64] sm:$0xf]  ;;  %v2720_v38 = vld [vmem:[#allocation5 + $0x70] sm:$0xf0] }
  0xd7   :  { %3192 = vst [vmem:[#allocation58_spill] sm:$0xff] %v2658_v26  ;;  %v2730_v56 = vld [vmem:[#allocation5 + $0x164] sm:$0xf]  ;;  %v2736_v48 = vld [vmem:[#allocation5 + $0x270] sm:$0xf0] }
  0xd8   :  { %v2734_v3 = vld [vmem:[#allocation5 + $0x264] sm:$0xf]  ;;  %v2740_v12 = vld [vmem:[#allocation5 + $0x370] sm:$0xf0]  ;;  %v3229_v32 = vld [vmem:[#allocation49_spill] sm:$0xff] }
  0xd9   :  { %v2738_v45 = vld [vmem:[#allocation5 + $0x364] sm:$0xf]  ;;  %3193 = vst [vmem:[#allocation59_spill] sm:$0xff] %v2740_v12  ;;  %v2744_v7 = vld [vmem:[#allocation5 + $0x50] sm:$0xf0]  ;;  %v2842_v12 = vpop.eup %2277 }
  0xda   :  { %v2742_v39 = vld [vmem:[#allocation5 + $0x44] sm:$0xf]  ;;  %3195 = vst [vmem:[#allocation61_spill] sm:$0xff] %v2744_v7  ;;  %v2758_v40 = vld [vmem:[#allocation5 + $0x250] sm:$0xf0]  ;;  %v2863_v15 = vrot.slane %v2842_v12, 1 }
  0xdb   :  { %3194 = vst [vmem:[#allocation60_spill] sm:$0xff] %v2742_v39  ;;  %v2752_v33 = vld [vmem:[#allocation5 + $0x144] sm:$0xf]  ;;  %v2774_v35 = vld [vmem:[#allocation5 + $0x350] sm:$0xf0]  ;;  %v2866_v50 = vrot.slane %v2842_v12, 2 }
  0xdc   :  { %v2756_v60 = vld [vmem:[#allocation5 + $0x244] sm:$0xf]  ;;  %3196 = vst [vmem:[#allocation62_spill] sm:$0xff] %v2758_v40  ;;  %v2793_v26 = vld [vmem:[#allocation5 + $0x130] sm:$0xf0]  ;;  %v2869_v17 = vrot.slane %v2842_v12, 3 }
  0xdd   :  { %v2760_v49 = vld [vmem:[#allocation5 + $0x344] sm:$0xf]  ;;  %3200 = vst [vmem:[#allocation64_spill] sm:$0xff] %v2774_v35  ;;  %v2808_v1 = vld [vmem:[#allocation5 + $0x230] sm:$0xf0]  ;;  %v2872_v28 = vrot.slane %v2842_v12, 4 }
  0xde   :  { %3197 = vst [vmem:[#allocation63_spill] sm:$0xff] %v2760_v49  ;;  %v2791_v4 = vld [vmem:[#allocation5 + $0x124] sm:$0xf]  ;;  %v2812_v34 = vld [vmem:[#allocation5 + $0x330] sm:$0xf0]  ;;  %v2875_v5 = vrot.slane %v2842_v12, 5 }
  0xdf   :  { %3204 = vst [vmem:[#allocation67_spill] sm:$0xff] %v2791_v4  ;;  %v2795_v21 = vld [vmem:[#allocation5 + $0x224] sm:$0xf]  ;;  %v2824_v62 = vld [vmem:[#allocation5 + $0x10] sm:$0xf0]  ;;  %v2878_v43 = vrot.slane %v2842_v12, 6 }
  0xe0   :  { %3205 = vst [vmem:[#allocation68_spill] sm:$0xff] %v2793_v26  ;;  %v2810_v0 = vld [vmem:[#allocation5 + $0x324] sm:$0xf]  ;;  %v2840_v39 = vld [vmem:[#allocation5 + $0x110] sm:$0xf0]  ;;  %v2887_v25 = vrot.slane %v2842_v12, 7 }
  0xe1   :  { %3206 = vst [vmem:[#allocation69_spill] sm:$0xff] %v2795_v21  ;;  %v2822_v24 = vld [vmem:[#allocation5 + $0x4] sm:$0xf]  ;;  %v3220_v31 = vld [vmem:[#allocation42_spill] sm:$0xff]  ;;  %v3235_v26 = vld [vmem:[#allocation47_spill] sm:$0xff] }
  0xe2   :  { %3208 = vst [vmem:[#allocation70_spill] sm:$0xff] %v2808_v1  ;;  %v2838_v7 = vld [vmem:[#allocation5 + $0x104] sm:$0xf]  ;;  %v3222_v52 = vor.u32 %v3220_v31, %v3221_v54  ;;  %v3230_v54 = vor.u32 %v2627_v41, %v3229_v32  ;;  %v3237_v4 = vld [vmem:[#allocation50_spill] sm:$0xff]  ;;  %v3243_v14 = vld [vmem:[#allocation53_spill] sm:$0xff] }
  0xe3   :  { %3209 = vst [vmem:[#allocation71_spill] sm:$0xff] %v2810_v0  ;;  %v3223_v23 = vld [vmem:[#allocation24_spill] sm:$0xff]  ;;  %v3227_v0 = vld [vmem:[#allocation43_spill] sm:$0xff] }
  0xe4   :  { %3210 = vst [vmem:[#allocation72_spill] sm:$0xff] %v2812_v34  ;;  %1401 = vmatpush.bf16.msra.mxu1 %v3222_v52  ;;  %v404_v44 = vmul.f32 %v2842_v12, %v3223_v23  ;;  %v3226_v34 = vld [vmem:[#allocation44_spill] sm:$0xff]  ;;  %1433 = vmatpush.bf16.msrb.mxu0 %v3230_v54  ;;  %v3246_v35 = vld [vmem:[#allocation55_spill] sm:$0xff] }
  0xe5   :  { %3211 = vst [vmem:[#allocation73_spill] sm:$0xff] %v2822_v24  ;;  %v3228_v30 = vor.u32 %v3226_v34, %v3227_v0  ;;  %v3231_v52 = vld [vmem:[#allocation20_spill] sm:$0xff]  ;;  %v3238_v34 = vld [vmem:[#allocation51_spill] sm:$0xff] }
  0xe6   :  { %3212 = vst [vmem:[#allocation74_spill] sm:$0xff] %v2824_v62  ;;  %v3225_v62 = vld [vmem:[#allocation12_spill] sm:$0xff]  ;;  %v416_v31 = vmul.f32 %v2869_v17, %v3231_v52  ;;  %v3239_v0 = vor.u32 %v3237_v4, %v3238_v34  ;;  %v436_v52 = vpack.c.bf16 %v404_v44, %v404_v44 }
  0xe7   :  { %3215 = vst [vmem:[#allocation75_spill] sm:$0xff] %v2838_v7  ;;  %v412_v24 = vmul.f32 %v2866_v50, %v3225_v62  ;;  %1414 = vmatpush.bf16.msra.mxu2 %v3228_v30  ;;  %v3232_v6 = vld [vmem:[#allocation32_spill] sm:$0xff] }
  0xe8   :  { %3216 = vst [vmem:[#allocation76_spill] sm:$0xff] %v2840_v39  ;;  %v3224_v39 = vld [vmem:[#allocation16_spill] sm:$0xff]  ;;  %v420_v23 = vmul.f32 %v2872_v28, %v3232_v6  ;;  %1446 = vmatpush.bf16.msrb.mxu1 %v3239_v0  ;;  %v448_v4 = vpack.c.bf16 %v416_v31, %v416_v31 }
  0xe9   :  { %v408_v7 = vmul.f32 %v2863_v15, %v3224_v39  ;;  %v3233_v1 = vld [vmem:[#allocation28_spill] sm:$0xff] }
  0xea   :  { %v424_v39 = vmul.f32 %v2875_v5, %v3233_v1  ;;  %v3234_v21 = vld [vmem:[#allocation48_spill] sm:$0xff]  ;;  %v444_v1 = vpack.c.bf16 %v412_v24, %v412_v24 }
  0xeb   :  { %v3236_v62 = vor.u32 %v3234_v21, %v3235_v26  ;;  %v3240_v30 = vld [vmem:[#allocation40_spill] sm:$0xff]  ;;  %v3245_v21 = vor.u32 %v2648_v22, %v2650_v37  ;;  %v440_v26 = vpack.c.bf16 %v408_v7, %v408_v7 }
  0xec   :  { %v428_v41 = vmul.f32 %v2878_v43, %v3240_v30  ;;  %v3241_v32 = vld [vmem:[#allocation36_spill] sm:$0xff]  ;;  %v456_v34 = vpack.c.bf16 %v424_v39, %v424_v39  ;;  %v646_v40 = vunpack.c.l.b16 %v444_v1  ;;  %v638_v39 = vunpack.c.l.b16 %v436_v52  ;;  %v3257_v52 = vld [vmem:[#allocation17_spill] sm:$0xff] }
  0xed   :  { %1427 = vmatpush.bf16.msra.mxu3 %v3236_v62  ;;  %v432_v54 = vmul.f32 %v2887_v25, %v3241_v32  ;;  %v3242_v6 = vld [vmem:[#allocation52_spill] sm:$0xff]  ;;  %v452_v62 = vpack.c.bf16 %v420_v23, %v420_v23  ;;  %v642_v49 = vunpack.c.l.b16 %v440_v26  ;;  %v3252_v23 = vor.u32 %v2666_v20, %v2668_v10 }
  0xee   :  { %v3244_v8 = vor.u32 %v3242_v6, %v3243_v14  ;;  %v460_v0 = vpack.c.bf16 %v428_v41, %v428_v41  ;;  %v3247_v32 = vld [vmem:[#allocation56_spill] sm:$0xff]  ;;  %v650_v14 = vunpack.c.l.b16 %v448_v4  ;;  %v3250_v6 = vld [vmem:[#allocation58_spill] sm:$0xff]  ;;  %v658_v22 = vunpack.c.l.b16 %v456_v34 }
  0xef   :  { %v464_v30 = vpack.c.bf16 %v432_v54, %v432_v54  ;;  %v3248_v44 = vor.u32 %v3246_v35, %v3247_v32  ;;  %v654_v7 = vunpack.c.l.b16 %v452_v62  ;;  %v3253_v35 = vor.u32 %v2670_v55, %v2672_v59 }
  0xf0   :  { %1459 = vmatpush.bf16.msrb.mxu2 %v3244_v8  ;;  %v3249_v8 = vld [vmem:[#allocation57_spill] sm:$0xff]  ;;  %v662_v24 = vunpack.c.l.b16 %v460_v0  ;;  %v670_v41 = vrot.slane %v642_v49, 7  ;;  %v673_v54 = vrot.slane %v646_v40, 6  ;;  %v682_v1 = vrot.slane %v658_v22, 3 }
  0xf1   :  { %1472 = vmatpush.bf16.msrb.mxu3 %v3245_v21  ;;  %1434 = vmatpush.bf16.msrb.mxu0 %v3248_v44  ;;  %v3251_v37 = vor.u32 %v3249_v8, %v3250_v6  ;;  %v666_v31 = vunpack.c.l.b16 %v464_v30  ;;  %v676_v21 = vrot.slane %v650_v14, 5  ;;  %v679_v26 = vrot.slane %v654_v7, 4  ;;  %v3256_v40 = vld [vmem:[#allocation25_spill] sm:$0xff] }
  0xf2   :  { %v3254_v4 = vor.u32 %v2674_v9, %v2676_v36  ;;  %v672_v62 = vsel %vm671_vm2, %v670_v41, %v638_v39  ;;  %v685_v10 = vrot.slane %v662_v24, 2  ;;  %v3255_v59 = vor.u32 %v2684_v61, %v2686_v13  ;;  %v3258_v0 = vld [vmem:[#allocation13_spill] sm:$0xff] }
  0xf3   :  { %1447 = vmatpush.bf16.msrb.mxu1 %v3251_v37  ;;  %v688_v20 = vrot.slane %v666_v31, 1  ;;  %v675_v49 = vsel %vm674_vm3, %v673_v54, %v672_v62  ;;  %v405_v55 = vmul.f32 %v2842_v12, %v3256_v40  ;;  %v409_v34 = vmul.f32 %v2863_v15, %v3257_v52  ;;  %v3261_v61 = vld [vmem:[#allocation21_spill] sm:$0xff]  ;;  %v3272_v52 = vld [vmem:[#allocation26_spill] sm:$0xff] }
  0xf4   :  { %1460 = vmatpush.bf16.msrb.mxu2 %v3252_v23  ;;  %v413_v9 = vmul.f32 %v2866_v50, %v3258_v0  ;;  %v3259_v36 = vor.u32 %v2688_v46, %v2690_v58  ;;  %v3260_v30 = vor.u32 %v2692_v19, %v2694_v27  ;;  %v678_v13 = vsel %vm677_vm4, %v676_v21, %v675_v49  ;;  %v3262_v44 = vld [vmem:[#allocation33_spill] sm:$0xff] }
  0xf5   :  { %1473 = vmatpush.bf16.msrb.mxu3 %v3253_v35  ;;  %1435 = vmatpush.bf16.msrb.mxu0 %v3254_v4  ;;  %v417_v32 = vmul.f32 %v2869_v17, %v3261_v61  ;;  %v421_v14 = vmul.f32 %v2872_v28, %v3262_v44  ;;  %v681_v8 = vsel %vm680_vm5, %v679_v26, %v678_v13  ;;  %v3263_v6 = vld [vmem:[#allocation29_spill] sm:$0xff]  ;;  %v3276_v13 = vld [vmem:[#allocation18_spill] sm:$0xff] }
  0xf6   :  { %v425_v37 = vmul.f32 %v2875_v5, %v3263_v6  ;;  %v3264_v46 = vld [vmem:[#allocation45_spill] sm:$0xff]  ;;  %v3266_v27 = vor.u32 %v2696_v63, %v2698_v57  ;;  %v684_v22 = vsel %vm683_vm6, %v682_v1, %v681_v8  ;;  %v437_v24 = vpack.c.bf16 %v405_v55, %v405_v55 }
  0xf7   :  { %1448 = vmatpush.bf16.msrb.mxu1 %v3255_v59  ;;  %v429_v58 = vmul.f32 %v2878_v43, %v3264_v46  ;;  %v3265_v7 = vld [vmem:[#allocation37_spill] sm:$0xff]  ;;  %v441_v31 = vpack.c.bf16 %v409_v34, %v409_v34  ;;  %v445_v23 = vpack.c.bf16 %v413_v9, %v413_v9  ;;  %v3267_v35 = vor.u32 %v2706_v53, %v2708_v18 }
  0xf8   :  { %1461 = vmatpush.bf16.msrb.mxu2 %v3259_v36  ;;  %v433_v19 = vmul.f32 %v2887_v25, %v3265_v7  ;;  %v687_v39 = vsel %vm686_vm7, %v685_v10, %v684_v22  ;;  %v449_v41 = vpack.c.bf16 %v417_v32, %v417_v32  ;;  %v453_v54 = vpack.c.bf16 %v421_v14, %v421_v14  ;;  %v3277_v32 = vld [vmem:[#allocation14_spill] sm:$0xff]  ;;  %v3280_v8 = vld [vmem:[#allocation61_spill] sm:$0xff] }
  0xf9   :  { %1474 = vmatpush.bf16.msrb.mxu3 %v3260_v30  ;;  %1436 = vmatpush.bf16.msrb.mxu0 %v3266_v27  ;;  %v457_v21 = vpack.c.bf16 %v425_v37, %v425_v37  ;;  %v3268_v26 = vor.u32 %v2710_v47, %v2712_v2  ;;  %v3269_v63 = vor.u32 %v2714_v16, %v2716_v42  ;;  %v643_v53 = vunpack.c.l.b16 %v441_v31  ;;  %v3278_v14 = vld [vmem:[#allocation22_spill] sm:$0xff] }
  0xfa   :  { %v690_v57 = vsel %vm689_vm8, %v688_v20, %v687_v39  ;;  %v461_v1 = vpack.c.bf16 %v429_v58, %v429_v58  ;;  %v465_v4 = vpack.c.bf16 %v433_v19, %v433_v19  ;;  %v647_v18 = vunpack.c.l.b16 %v445_v23  ;;  %v3282_v37 = vld [vmem:[#allocation34_spill] sm:$0xff] }
  0xfb   :  { %1449 = vmatpush.bf16.msrb.mxu1 %v3267_v35  ;;  %v2982_v62 = vpack.c.b16 %v690_v57, %v690_v57  ;;  %v651_v10 = vunpack.c.l.b16 %v449_v41  ;;  %v3270_v59 = vor.u32 %v2718_v29, %v2720_v38  ;;  %v639_v49 = vunpack.c.l.b16 %v437_v24  ;;  %v3274_v38 = vld [vmem:[#allocation59_spill] sm:$0xff]  ;;  %v3283_v58 = vld [vmem:[#allocation30_spill] sm:$0xff]  ;;  %v2198_v24 = vld [vmem:[#allocation5 + $0x204] sm:$0xf] }
  0xfc   :  { %1462 = vmatpush.bf16.msrb.mxu2 %v3268_v26  ;;  %v655_v2 = vunpack.c.l.b16 %v453_v54  ;;  %v659_v47 = vunpack.c.l.b16 %v457_v21  ;;  %v663_v40 = vunpack.c.l.b16 %v461_v1  ;;  %v3271_v16 = vor.u32 %v2730_v56, %v2732_v11  ;;  %v3284_v19 = vld [vmem:[#allocation46_spill] sm:$0xff]  ;;  %v3290_v57 = vld [vmem:[#allocation64_spill] sm:$0xff] }
  0xfd   :  { %1475 = vmatpush.bf16.msrb.mxu3 %v3269_v63  ;;  %1437 = vmatpush.bf16.msrb.mxu0 %v3270_v59  ;;  %v667_v42 = vunpack.c.l.b16 %v465_v4  ;;  %v691_v20 = vrot.slane %v643_v53, 7  ;;  %v693_v55 = vrot.slane %v647_v18, 6  ;;  %v406_v34 = vmul.f32 %v2842_v12, %v3272_v52  ;;  %v1882_v31 = vld [vmem:[#allocation5 + $0x210] sm:$0xf0]  ;;  %v3289_v63 = vld [vmem:[#allocation63_spill] sm:$0xff] }
  0xfe   :  { %1389 = vmatmul.bf16.vlgmr.msra.gmra.mxu0 %v2982_v62  ;;  %v3273_v29 = vor.u32 %v2734_v3, %v2736_v48  ;;  %v3275_v0 = vor.u32 %v2738_v45, %v3274_v38  ;;  %v695_v9 = vrot.slane %v651_v10, 5  ;;  %v697_v36 = vrot.slane %v655_v2, 4  ;;  %v3279_v48 = vld [vmem:[#allocation60_spill] sm:$0xff]  ;;  %v3286_v35 = vld [vmem:[#allocation38_spill] sm:$0xff] }
  0xff   :  { %1450 = vmatpush.bf16.msrb.mxu1 %v3271_v16  ;;  %v699_v11 = vrot.slane %v659_v47, 3  ;;  %v701_v56 = vrot.slane %v663_v40, 2  ;;  %v692_v30 = vsel %vm671_vm2, %v691_v20, %v639_v49  ;;  %v410_v61 = vmul.f32 %v2863_v15, %v3276_v13  ;;  %v3287_v21 = vld [vmem:[#allocation62_spill] sm:$0xff]  ;;  %v2230_v18 = vld [vmem:[#allocation5 + $0x304] sm:$0xf]  ;;  %v3292_v40 = vld [vmem:[#allocation65_spill] sm:$0xff] }
 0x100   :  { %1463 = vmatpush.bf16.msrb.mxu2 %v3273_v29  ;;  %v414_v44 = vmul.f32 %v2866_v50, %v3277_v32  ;;  %v418_v3 = vmul.f32 %v2869_v17, %v3278_v14  ;;  %v3281_v6 = vor.u32 %v3279_v48, %v3280_v8  ;;  %v694_v45 = vsel %vm674_vm3, %v693_v55, %v692_v30  ;;  %v2010_v10 = vld [vmem:[#allocation5 + $0x310] sm:$0xf0]  ;;  %v3295_v29 = vld [vmem:[#allocation67_spill] sm:$0xff]  ;;  %v3298_v30 = vld [vmem:[#allocation69_spill] sm:$0xff] }
 0x101   :  { %1476 = vmatpush.bf16.msrb.mxu3 %v3275_v0  ;;  %v422_v46 = vmul.f32 %v2872_v28, %v3282_v37  ;;  %v426_v7 = vmul.f32 %v2875_v5, %v3283_v58  ;;  %v430_v27 = vmul.f32 %v2878_v43, %v3284_v19  ;;  %v3285_v22 = vor.u32 %v2752_v33, %v2754_v51  ;;  %v3293_v16 = vld [vmem:[#allocation66_spill] sm:$0xff]  ;;  %v3301_v32 = vld [vmem:[#allocation71_spill] sm:$0xff]  ;;  %v3304_v58 = vld [vmem:[#allocation73_spill] sm:$0xff] }
 0x102   :  { %1438 = vmatpush.bf16.msrb.mxu0 %v3281_v6  ;;  %v696_v23 = vsel %vm677_vm4, %v695_v9, %v694_v45  ;;  %v434_v39 = vmul.f32 %v2887_v25, %v3286_v35  ;;  %v438_v41 = vpack.c.bf16 %v406_v34, %v406_v34  ;;  %v442_v54 = vpack.c.bf16 %v410_v61, %v410_v61  ;;  %v3299_v13 = vld [vmem:[#allocation70_spill] sm:$0xff]  ;;  %v3308_v35 = vld [vmem:[#allocation75_spill] sm:$0xff] }
 0x103   :  { %1451 = vmatpush.bf16.msrb.mxu1 %v3285_v22  ;;  %v3288_v26 = vor.u32 %v2756_v60, %v3287_v21  ;;  %v3291_v1 = vor.u32 %v3289_v63, %v3290_v57  ;;  %v698_v51 = vsel %vm680_vm5, %v697_v36, %v696_v23  ;;  %v703_v33 = vrot.slane %v667_v42, 1  ;;  %v3296_v42 = vld [vmem:[#allocation68_spill] sm:$0xff]  ;;  %v3311_v21 = vld [vmem:[#allocation19_spill] sm:$0xff] }
 0x104   :  { %v446_v4 = vpack.c.bf16 %v414_v44, %v414_v44  ;;  %v450_v53 = vpack.c.bf16 %v418_v3, %v418_v3  ;;  %v700_v59 = vsel %vm683_vm6, %v699_v11, %v698_v51  ;;  %v454_v49 = vpack.c.bf16 %v422_v46, %v422_v46  ;;  %v3302_v44 = vld [vmem:[#allocation72_spill] sm:$0xff]  ;;  %v3312_v63 = vld [vmem:[#allocation15_spill] sm:$0xff] }
 0x105   :  { %1464 = vmatpush.bf16.msrb.mxu2 %v3288_v26  ;;  %1477 = vmatpush.bf16.msrb.mxu3 %v3291_v1  ;;  %v458_v2 = vpack.c.bf16 %v426_v7, %v426_v7  ;;  %v462_v47 = vpack.c.bf16 %v430_v27, %v430_v27  ;;  %v3294_v60 = vor.u32 %v3292_v40, %v3293_v16  ;;  %v644_v34 = vunpack.c.l.b16 %v442_v54  ;;  %v3305_v7 = vld [vmem:[#allocation74_spill] sm:$0xff]  ;;  %v3313_v1 = vld [vmem:[#allocation23_spill] sm:$0xff] }
 0x106   :  { %v1885_v20 = vor.u32 %v2198_v24, %v1882_v31  ;;  %v702_v55 = vsel %vm686_vm7, %v701_v56, %v700_v59  ;;  %v466_v52 = vpack.c.bf16 %v434_v39, %v434_v39  ;;  %v3297_v38 = vor.u32 %v3295_v29, %v3296_v42  ;;  %v3307_v31 = vld [vmem:[#allocation27_spill] sm:$0xff]  ;;  %v3309_v39 = vld [vmem:[#allocation76_spill] sm:$0xff] }
 0x107   :  { %1439 = vmatpush.bf16.msrb.mxu0 %v3294_v60  ;;  %v704_v0 = vsel %vm689_vm8, %v703_v33, %v702_v55  ;;  %v648_v9 = vunpack.c.l.b16 %v446_v4  ;;  %v652_v36 = vunpack.c.l.b16 %v450_v53  ;;  %v656_v11 = vunpack.c.l.b16 %v454_v49  ;;  %v3314_v4 = vld [vmem:[#allocation35_spill] sm:$0xff]  ;;  %v3316_v49 = vld [vmem:[#allocation54_spill] sm:$0xff]  ;;  %v1744_v42 = vld [vmem:[#allocation5 + $0xe8] sm:$0xf] }
 0x108   :  { %1452 = vmatpush.bf16.msrb.mxu1 %v3297_v38  ;;  %v3300_v61 = vor.u32 %v3298_v30, %v3299_v13  ;;  %v3303_v14 = vor.u32 %v3301_v32, %v3302_v44  ;;  %v2013_v56 = vor.u32 %v2230_v18, %v2010_v10  ;;  %v3044_v3 = vpack.c.b16 %v704_v0, %v704_v0  ;;  %v3315_v18 = vld [vmem:[#allocation31_spill] sm:$0xff]  ;;  %v2229_v32 = vld [vmem:[#allocation5 + $0x2f4] sm:$0xf0]  ;;  %v1728_v44 = vld [vmem:[#allocation5 + $0xc8] sm:$0xf] }
 0x109   :  { %v660_v48 = vunpack.c.l.b16 %v458_v2  ;;  %v664_v8 = vunpack.c.l.b16 %v462_v47  ;;  %v640_v6 = vunpack.c.l.b16 %v438_v41  ;;  %v668_v45 = vunpack.c.l.b16 %v466_v52  ;;  %v3317_v2 = vld [vmem:[#allocation39_spill] sm:$0xff] }
 0x10a   :  { %1465 = vmatpush.bf16.msrb.mxu2 %v3300_v61  ;;  %1478 = vmatpush.bf16.msrb.mxu3 %v3303_v14  ;;  %v705_v37 = vrot.slane %v644_v34, 7  ;;  %v707_v46 = vrot.slane %v648_v9, 6  ;;  %v3306_v19 = vor.u32 %v3304_v58, %v3305_v7  ;;  %v709_v27 = vrot.slane %v652_v36, 5  ;;  %v2165_v9 = vld [vmem:[#allocation5 + $0xf4] sm:$0xf0] }
 0x10b   :  { %1402 = vmatmul.bf16.vlgmr.msra.gmra.mxu1 %v3044_v3  ;;  %v711_v22 = vrot.slane %v656_v11, 4  ;;  %v713_v24 = vrot.slane %v660_v48, 3  ;;  %v407_v23 = vmul.f32 %v2842_v12, %v3307_v31  ;;  %v3310_v54 = vor.u32 %v3308_v35, %v3309_v39  ;;  %v1872_v36 = vld [vmem:[#allocation5 + $0x1e8] sm:$0xf]  ;;  %v2197_v11 = vld [vmem:[#allocation5 + $0x1f4] sm:$0xf0] }
 0x10c   :  { %1440 = vmatpush.bf16.msrb.mxu0 %v3306_v19  ;;  %v706_v41 = vsel %vm671_vm2, %v705_v37, %v640_v6  ;;  %v411_v26 = vmul.f32 %v2863_v15, %v3311_v21  ;;  %v415_v57 = vmul.f32 %v2866_v50, %v3312_v63  ;;  %v419_v51 = vmul.f32 %v2869_v17, %v3313_v1  ;;  %v2000_v61 = vld [vmem:[#allocation5 + $0x2e8] sm:$0xf]  ;;  %v2161_v6 = vld [vmem:[#allocation5 + $0xd4] sm:$0xf0] }
 0x10d   :  { %1453 = vmatpush.bf16.msrb.mxu1 %v3310_v54  ;;  %v708_v33 = vsel %vm674_vm3, %v707_v46, %v706_v41  ;;  %v715_v12 = vrot.slane %v664_v8, 2  ;;  %v423_v53 = vmul.f32 %v2872_v28, %v3314_v4  ;;  %v427_v10 = vmul.f32 %v2875_v5, %v3315_v18  ;;  %v2193_v7 = vld [vmem:[#allocation5 + $0x1d4] sm:$0xf0]  ;;  %v1984_v19 = vld [vmem:[#allocation5 + $0x2c8] sm:$0xf] }
 0x10e   :  { %1466 = vmatpush.bf16.msrb.mxu2 %v1885_v20  ;;  %1479 = vmatpush.bf16.msrb.mxu3 %v2013_v56  ;;  %v710_v59 = vsel %vm677_vm4, %v709_v27, %v708_v33  ;;  %v717_v15 = vrot.slane %v668_v45, 1  ;;  %v431_v50 = vmul.f32 %v2878_v43, %v3316_v49  ;;  %v435_v17 = vmul.f32 %v2887_v25, %v3317_v2  ;;  %v1856_v45 = vld [vmem:[#allocation5 + $0x1c8] sm:$0xf]  ;;  %v2225_v27 = vld [vmem:[#allocation5 + $0x2d4] sm:$0xf0] }
 0x10f   :  { %v712_v47 = vsel %vm680_vm5, %v711_v22, %v710_v59  ;;  %v443_v40 = vpack.c.bf16 %v411_v26, %v411_v26  ;;  %v447_v16 = vpack.c.bf16 %v415_v57, %v415_v57  ;;  %v451_v60 = vpack.c.bf16 %v419_v51, %v419_v51  ;;  %1441 = vmatmul.bf16.vlgmr.msrb.gmra.mxu0 %v2982_v62  ;;  %v2128_v54 = vld [vmem:[#allocation5 + $0x3e8] sm:$0xf]  ;;  %v2261_v41 = vld [vmem:[#allocation5 + $0x3f4] sm:$0xf0] }
 0x110   :  { %v714_v20 = vsel %vm683_vm6, %v713_v24, %v712_v47  ;;  %v439_v28 = vpack.c.bf16 %v407_v23, %v407_v23  ;;  %v455_v55 = vpack.c.bf16 %v423_v53, %v423_v53  ;;  %v459_v52 = vpack.c.bf16 %v427_v10, %v427_v10  ;;  %v1712_v51 = vld [vmem:[#allocation5 + $0xa8] sm:$0xf]  ;;  %v2157_v33 = vld [vmem:[#allocation5 + $0xb4] sm:$0xf0] }
 0x111   :  { %v716_v5 = vsel %vm686_vm7, %v715_v12, %v714_v20  ;;  %v463_v34 = vpack.c.bf16 %v431_v50, %v431_v50  ;;  %v467_v29 = vpack.c.bf16 %v435_v17, %v435_v17  ;;  %v645_v43 = vunpack.c.l.b16 %v443_v40  ;;  %v1840_v53 = vld [vmem:[#allocation5 + $0x1a8] sm:$0xf]  ;;  %v2189_v18 = vld [vmem:[#allocation5 + $0x1b4] sm:$0xf0] }
 0x112   :  { %v718_v25 = vsel %vm689_vm8, %v717_v15, %v716_v5  ;;  %v649_v38 = vunpack.c.l.b16 %v447_v16  ;;  %v653_v0 = vunpack.c.l.b16 %v451_v60  ;;  %v657_v13 = vunpack.c.l.b16 %v455_v55  ;;  %v1968_v15 = vld [vmem:[#allocation5 + $0x2a8] sm:$0xf]  ;;  %v2221_v49 = vld [vmem:[#allocation5 + $0x2b4] sm:$0xf0] }
 0x113   :  { %v3077_v30 = vpack.c.b16 %v718_v25, %v718_v25  ;;  %v641_v14 = vunpack.c.l.b16 %v439_v28  ;;  %v661_v56 = vunpack.c.l.b16 %v459_v52  ;;  %v719_v48 = vrot.slane %v645_v43, 7  ;;  %v2112_v40 = vld [vmem:[#allocation5 + $0x3c8] sm:$0xf]  ;;  %v2153_v20 = vld [vmem:[#allocation5 + $0x94] sm:$0xf0] }
 0x114   :  { %v721_v8 = vrot.slane %v649_v38, 6  ;;  %v665_v37 = vunpack.c.l.b16 %v463_v34  ;;  %v669_v46 = vunpack.c.l.b16 %v467_v29  ;;  %v1745_v58 = vor.u32 %v2165_v9, %v1744_v42  ;;  %v1696_v60 = vld [vmem:[#allocation5 + $0x88] sm:$0xf]  ;;  %v2257_v55 = vld [vmem:[#allocation5 + $0x3d4] sm:$0xf0] }
 0x115   :  { %1415 = vmatmul.bf16.vlgmr.msra.gmra.mxu2 %v3077_v30  ;;  %v720_v22 = vsel %vm671_vm2, %v719_v48, %v641_v14  ;;  %v723_v24 = vrot.slane %v653_v0, 5  ;;  %v1873_v31 = vor.u32 %v2197_v11, %v1872_v36  ;;  %v2001_v23 = vor.u32 %v2229_v32, %v2000_v61  ;;  %v1824_v5 = vld [vmem:[#allocation5 + $0x188] sm:$0xf]  ;;  %v2185_v34 = vld [vmem:[#allocation5 + $0x194] sm:$0xf0] }
 0x116   :  { %v722_v35 = vsel %vm674_vm3, %v721_v8, %v720_v22  ;;  %v725_v39 = vrot.slane %v657_v13, 4  ;;  %1485 = vmatpush.bf16.msra.mxu0 %v1745_v58  ;;  %v1729_v21 = vor.u32 %v2161_v6, %v1728_v44  ;;  %v727_v63 = vrot.slane %v661_v56, 3  ;;  %v1952_v29 = vld [vmem:[#allocation5 + $0x288] sm:$0xf]  ;;  %v2217_v43 = vld [vmem:[#allocation5 + $0x294] sm:$0xf0] }
 0x117   :  { %v724_v26 = vsel %vm677_vm4, %v723_v24, %v722_v35  ;;  %1498 = vmatpush.bf16.msra.mxu1 %v1873_v31  ;;  %1511 = vmatpush.bf16.msra.mxu2 %v2001_v23  ;;  %v1857_v57 = vor.u32 %v2193_v7, %v1856_v45  ;;  %v1985_v1 = vor.u32 %v2225_v27, %v1984_v19  ;;  %v729_v4 = vrot.slane %v665_v37, 2  ;;  %v2096_v38 = vld [vmem:[#allocation5 + $0x3a8] sm:$0xf]  ;;  %v2149_v36 = vld [vmem:[#allocation5 + $0x74] sm:$0xf0] }
 0x118   :  { %v726_v12 = vsel %vm680_vm5, %v725_v39, %v724_v26  ;;  %v731_v59 = vrot.slane %v669_v46, 1  ;;  %v1713_v2 = vor.u32 %v2157_v33, %v1712_v51  ;;  %v2129_v47 = vor.u32 %v2261_v41, %v2128_v54  ;;  %v1680_v9 = vld [vmem:[#allocation5 + $0x68] sm:$0xf]  ;;  %v2253_v11 = vld [vmem:[#allocation5 + $0x3b4] sm:$0xf0] }
 0x119   :  { %v728_v10 = vsel %vm683_vm6, %v727_v63, %v726_v12  ;;  %v1841_v16 = vor.u32 %v2189_v18, %v1840_v53  ;;  %v1969_v52 = vor.u32 %v2221_v49, %v1968_v15  ;;  %v1697_v42 = vor.u32 %v2153_v20, %v1696_v60  ;;  %v1808_v61 = vld [vmem:[#allocation5 + $0x168] sm:$0xf]  ;;  %v2181_v32 = vld [vmem:[#allocation5 + $0x174] sm:$0xf0]  ;;  %v2195_v60 = vld [vmem:[#allocation5 + $0x1ec] sm:$0xf] }
 0x11a   :  { %v730_v50 = vsel %vm686_vm7, %v729_v4, %v728_v10  ;;  %1486 = vmatpush.bf16.msra.mxu0 %v1729_v21  ;;  %v2113_v25 = vor.u32 %v2257_v55, %v2112_v40  ;;  %v1825_v0 = vor.u32 %v2185_v34, %v1824_v5  ;;  %v1953_v13 = vor.u32 %v2217_v43, %v1952_v29  ;;  %v1936_v44 = vld [vmem:[#allocation5 + $0x268] sm:$0xf]  ;;  %v2213_v14 = vld [vmem:[#allocation5 + $0x274] sm:$0xf0]  ;;  %v2163_v40 = vld [vmem:[#allocation5 + $0xec] sm:$0xf] }
 0x11b   :  { %1454 = vmatmul.bf16.vlgmr.msrb.gmra.mxu1 %v3044_v3  ;;  %v732_v17 = vsel %vm689_vm8, %v731_v59, %v730_v50  ;;  %1512 = vmatpush.bf16.msra.mxu2 %v1985_v1  ;;  %v1681_v56 = vor.u32 %v2149_v36, %v1680_v9  ;;  %v2097_v48 = vor.u32 %v2253_v11, %v2096_v38  ;;  %v2080_v8 = vld [vmem:[#allocation5 + $0x388] sm:$0xf]  ;;  %v2145_v37 = vld [vmem:[#allocation5 + $0x54] sm:$0xf0]  ;;  %v2389_v33 = vmov 0  }
 0x11c   :  { %1499 = vmatpush.bf16.msra.mxu1 %v1857_v57  ;;  %v3088_v28 = vpack.c.b16 %v732_v17, %v732_v17  ;;  %v1809_v6 = vor.u32 %v2181_v32, %v1808_v61  ;;  %v1664_v45 = vld [vmem:[#allocation5 + $0x48] sm:$0xf]  ;;  %v2249_v46 = vld [vmem:[#allocation5 + $0x394] sm:$0xf0]  ;;  %v1937_v58 = vor.u32 %v2213_v14, %v1936_v44  ;;  %v1589_v57 = vld [vmem:[%s3109_s2] sm:$0xff]  ;;  %2275 = vset.pattern.permute.xlu2 %v2389_v33  ;;  %s2390_s2 = smov [#allocation8]  }
 0x11d   :  { %v1792_v7 = vld [vmem:[#allocation5 + $0x148] sm:$0xf]  ;;  %v2177_v19 = vld [vmem:[#allocation5 + $0x154] sm:$0xf0]  ;;  %v1665_v31 = vor.u32 %v2145_v37, %v1664_v45  ;;  %v2081_v23 = vor.u32 %v2249_v46, %v2080_v8  ;;  %2276 = vset.pattern.permute.xlu0 %v2389_v33  ;;  %1592 = vperm.xlu2 %2275, %v1589_v57   ;;  %v1874_v55 = vld [vmem:[#allocation5 + $0x1f8] sm:$0xf0] }
 0x11e   :  { %1428 = vmatmul.bf16.vlgmr.msra.gmra.mxu3 %v3088_v28  ;;  %1487 = vmatpush.bf16.msra.mxu0 %v1713_v2  ;;  %v1920_v27 = vld [vmem:[#allocation5 + $0x248] sm:$0xf]  ;;  %v2209_v22 = vld [vmem:[#allocation5 + $0x254] sm:$0xf0]  ;;  %v1793_v39 = vor.u32 %v2177_v19, %v1792_v7  ;;  %v2002_v5 = vld [vmem:[#allocation5 + $0x2f8] sm:$0xf0] }
 0x11f   :  { %1524 = vmatpush.bf16.msra.mxu3 %v2129_v47  ;;  %1513 = vmatpush.bf16.msra.mxu2 %v1969_v52  ;;  %v2064_v24 = vld [vmem:[#allocation5 + $0x368] sm:$0xf]  ;;  %v2245_v35 = vld [vmem:[#allocation5 + $0x374] sm:$0xf0]  ;;  %v1921_v21 = vor.u32 %v2209_v22, %v1920_v27  ;;  %v2227_v52 = vld [vmem:[#allocation5 + $0x2ec] sm:$0xf] }
 0x120   :  { %1500 = vmatpush.bf16.msra.mxu1 %v1841_v16  ;;  %v1648_v54 = vld [vmem:[#allocation5 + $0x28] sm:$0xf]  ;;  %v2141_v41 = vld [vmem:[#allocation5 + $0x34] sm:$0xf0]  ;;  %v2065_v18 = vor.u32 %v2245_v35, %v2064_v24  ;;  %v1746_v16 = vld [vmem:[#allocation5 + $0xf8] sm:$0xf0]  ;;  %v2005_v9 = vor.u32 %v2227_v52, %v2002_v5 }
 0x121   :  { %v1776_v26 = vld [vmem:[#allocation5 + $0x128] sm:$0xf]  ;;  %v2173_v63 = vld [vmem:[#allocation5 + $0x134] sm:$0xf0]  ;;  %v1649_v53 = vor.u32 %v2141_v41, %v1648_v54  ;;  %v1749_v38 = vor.u32 %v2163_v40, %v1746_v16  ;;  %v2159_v36 = vld [vmem:[#allocation5 + $0xcc] sm:$0xf] }
 0x122   :  { %1488 = vmatpush.bf16.msra.mxu0 %v1697_v42  ;;  %v1904_v1 = vld [vmem:[#allocation5 + $0x228] sm:$0xf]  ;;  %v2205_v51 = vld [vmem:[#allocation5 + $0x234] sm:$0xf0]  ;;  %v1777_v10 = vor.u32 %v2173_v63, %v1776_v26  ;;  %v1730_v11 = vld [vmem:[#allocation5 + $0xd8] sm:$0xf0] }
 0x123   :  { %1525 = vmatpush.bf16.msra.mxu3 %v2113_v25  ;;  %1514 = vmatpush.bf16.msra.mxu2 %v1953_v13  ;;  %v2048_v12 = vld [vmem:[#allocation5 + $0x348] sm:$0xf]  ;;  %v2241_v4 = vld [vmem:[#allocation5 + $0x354] sm:$0xf0]  ;;  %v1905_v50 = vor.u32 %v2205_v51, %v1904_v1  ;;  %v2191_v13 = vld [vmem:[#allocation5 + $0x1cc] sm:$0xf]  ;;  %v1733_v45 = vor.u32 %v2159_v36, %v1730_v11 }
 0x124   :  { %1501 = vmatpush.bf16.msra.mxu1 %v1825_v0  ;;  %v1632_v59 = vld [vmem:[#allocation5 + $0x8] sm:$0xf]  ;;  %v2137_v15 = vld [vmem:[#allocation5 + $0x14] sm:$0xf0]  ;;  %v2049_v34 = vor.u32 %v2241_v4, %v2048_v12  ;;  %v1877_v0 = vor.u32 %v2195_v60, %v1874_v55  ;;  %v1858_v61 = vld [vmem:[#allocation5 + $0x1d8] sm:$0xf0] }
 0x125   :  { %1467 = vmatmul.bf16.vlgmr.msrb.gmra.mxu2 %v3077_v30  ;;  %v1760_v49 = vld [vmem:[#allocation5 + $0x108] sm:$0xf]  ;;  %v2169_v2 = vld [vmem:[#allocation5 + $0x114] sm:$0xf0]  ;;  %v1633_v20 = vor.u32 %v2137_v15, %v1632_v59  ;;  %v2223_v32 = vld [vmem:[#allocation5 + $0x2cc] sm:$0xf]  ;;  %v1861_v37 = vor.u32 %v2191_v13, %v1858_v61 }
 0x126   :  { %1489 = vmatpush.bf16.msra.mxu0 %v1681_v56  ;;  %v1888_v17 = vld [vmem:[#allocation5 + $0x208] sm:$0xf]  ;;  %v2201_v47 = vld [vmem:[#allocation5 + $0x214] sm:$0xf0]  ;;  %v1761_v29 = vor.u32 %v2169_v2, %v1760_v49  ;;  %v1986_v44 = vld [vmem:[#allocation5 + $0x2d8] sm:$0xf0] }
 0x127   :  { %1526 = vmatpush.bf16.msra.mxu3 %v2097_v48  ;;  %1515 = vmatpush.bf16.msra.mxu2 %v1937_v58  ;;  %v2032_v43 = vld [vmem:[#allocation5 + $0x328] sm:$0xf]  ;;  %v2237_v42 = vld [vmem:[#allocation5 + $0x334] sm:$0xf0]  ;;  %v1889_v25 = vor.u32 %v2201_v47, %v1888_v17  ;;  %v2259_v8 = vld [vmem:[#allocation5 + $0x3ec] sm:$0xf]  ;;  %v1989_v46 = vor.u32 %v2223_v32, %v1986_v44 }
 0x128   :  { %1502 = vmatpush.bf16.msra.mxu1 %v1809_v6  ;;  %v2033_v14 = vor.u32 %v2237_v42, %v2032_v43  ;;  %v2016_v56 = vld [vmem:[#allocation5 + $0x308] sm:$0xf]  ;;  %v2233_v48 = vld [vmem:[#allocation5 + $0x314] sm:$0xf0]  ;;  %v2130_v6 = vld [vmem:[#allocation5 + $0x3f8] sm:$0xf0] }
 0x129   :  { %v2155_v58 = vld [vmem:[#allocation5 + $0xac] sm:$0xf]  ;;  %v1714_v7 = vld [vmem:[#allocation5 + $0xb8] sm:$0xf0]  ;;  %s1608_s12 = sshll.u32 %s2390_s2, 4  ;;  %s1609_s12 = int_to_ptr.vmem [resolvable:$true] %s1608_s12 }
 0x12a   :  { %1490 = vmatpush.bf16.msra.mxu0 %v1665_v31  ;;  %v2187_v19 = vld [vmem:[#allocation5 + $0x1ac] sm:$0xf]  ;;  %v1842_v27 = vld [vmem:[#allocation5 + $0x1b8] sm:$0xf0]  ;;  %v2017_v31 = vor.u32 %v2233_v48, %v2016_v56  ;;  %v1717_v54 = vor.u32 %v2155_v58, %v1714_v7 }
 0x12b   :  { %1527 = vmatpush.bf16.msra.mxu3 %v2081_v23  ;;  %1516 = vmatpush.bf16.msra.mxu2 %v1921_v21  ;;  %v2219_v22 = vld [vmem:[#allocation5 + $0x2ac] sm:$0xf]  ;;  %v1970_v24 = vld [vmem:[#allocation5 + $0x2b8] sm:$0xf0]  ;;  %v2133_v23 = vor.u32 %v2259_v8, %v2130_v6  ;;  %v1845_v41 = vor.u32 %v2187_v19, %v1842_v27 }
 0x12c   :  { %1503 = vmatpush.bf16.msra.mxu1 %v1793_v39  ;;  %v2255_v35 = vld [vmem:[#allocation5 + $0x3cc] sm:$0xf]  ;;  %v2114_v39 = vld [vmem:[#allocation5 + $0x3d8] sm:$0xf0]  ;;  %v1973_v21 = vor.u32 %v2219_v22, %v1970_v24 }
 0x12d   :  { %v2151_v26 = vld [vmem:[#allocation5 + $0x8c] sm:$0xf]  ;;  %v1698_v63 = vld [vmem:[#allocation5 + $0x98] sm:$0xf0]  ;;  %v2117_v12 = vor.u32 %v2255_v35, %v2114_v39 }
 0x12e   :  { %1480 = vmatmul.bf16.vlgmr.msrb.gmra.mxu3 %v3088_v28  ;;  %1491 = vmatpush.bf16.msra.mxu0 %v1649_v53  ;;  %v2183_v57 = vld [vmem:[#allocation5 + $0x18c] sm:$0xf]  ;;  %v1826_v1 = vld [vmem:[#allocation5 + $0x198] sm:$0xf0] }
 0x12f   :  { %1528 = vmatpush.bf16.msra.mxu3 %v2065_v18  ;;  %1517 = vmatpush.bf16.msra.mxu2 %v1905_v50  ;;  %v2215_v51 = vld [vmem:[#allocation5 + $0x28c] sm:$0xf]  ;;  %v1954_v33 = vld [vmem:[#allocation5 + $0x298] sm:$0xf0]  ;;  %v1701_v18 = vor.u32 %v2151_v26, %v1698_v63 }
 0x130   :  { %1504 = vmatpush.bf16.msra.mxu1 %v1777_v10  ;;  %v2251_v4 = vld [vmem:[#allocation5 + $0x3ac] sm:$0xf]  ;;  %v2098_v53 = vld [vmem:[#allocation5 + $0x3b8] sm:$0xf0]  ;;  %v1829_v10 = vor.u32 %v2183_v57, %v1826_v1  ;;  %v1957_v59 = vor.u32 %v2215_v51, %v1954_v33 }
 0x131   :  { %v2147_v15 = vld [vmem:[#allocation5 + $0x6c] sm:$0xf]  ;;  %v1682_v49 = vld [vmem:[#allocation5 + $0x78] sm:$0xf0]  ;;  %v2101_v40 = vor.u32 %v2251_v4, %v2098_v53 }
 0x132   :  { %1492 = vmatpush.bf16.msra.mxu0 %v1633_v20  ;;  %v2179_v50 = vld [vmem:[#allocation5 + $0x16c] sm:$0xf]  ;;  %v1810_v2 = vld [vmem:[#allocation5 + $0x178] sm:$0xf0]  ;;  %v1685_v20 = vor.u32 %v2147_v15, %v1682_v49 }
 0x133   :  { %1529 = vmatpush.bf16.msra.mxu3 %v2049_v34  ;;  %1518 = vmatpush.bf16.msra.mxu2 %v1889_v25  ;;  %v2211_v17 = vld [vmem:[#allocation5 + $0x26c] sm:$0xf]  ;;  %v1938_v47 = vld [vmem:[#allocation5 + $0x278] sm:$0xf0]  ;;  %v1813_v55 = vor.u32 %v2179_v50, %v1810_v2 }
 0x134   :  { %1505 = vmatpush.bf16.msra.mxu1 %v1761_v29  ;;  %v2247_v16 = vld [vmem:[#allocation5 + $0x38c] sm:$0xf]  ;;  %v2082_v60 = vld [vmem:[#allocation5 + $0x398] sm:$0xf0]  ;;  %v1941_v52 = vor.u32 %v2211_v17, %v1938_v47 }
 0x135   :  { %1493 = vmatmul.bf16.vlgmr.msra.gmra.mxu0 %v2982_v62  ;;  %v2143_v5 = vld [vmem:[#allocation5 + $0x4c] sm:$0xf]  ;;  %v1666_v34 = vld [vmem:[#allocation5 + $0x58] sm:$0xf0] }
 0x136   :  { %1537 = vmatpush.bf16.msrb.mxu0 %v1749_v38  ;;  %1519 = vmatmul.bf16.vlgmr.msra.gmra.mxu2 %v3077_v30  ;;  %v2175_v29 = vld [vmem:[#allocation5 + $0x14c] sm:$0xf]  ;;  %v1794_v43 = vld [vmem:[#allocation5 + $0x158] sm:$0xf0]  ;;  %v2085_v38 = vor.u32 %v2247_v16, %v2082_v60  ;;  %v1669_v36 = vor.u32 %v2143_v5, %v1666_v34 }
 0x137   :  { %1563 = vmatpush.bf16.msrb.mxu2 %v2005_v9  ;;  %1506 = vmatmul.bf16.vlgmr.msra.gmra.mxu1 %v3044_v3  ;;  %v2207_v42 = vld [vmem:[#allocation5 + $0x24c] sm:$0xf]  ;;  %v1922_v25 = vld [vmem:[#allocation5 + $0x258] sm:$0xf0]  ;;  %v1797_v11 = vor.u32 %v2175_v29, %v1794_v43 }
 0x138   :  { %1550 = vmatpush.bf16.msrb.mxu1 %v1877_v0  ;;  %1530 = vmatpush.bf16.msra.mxu3 %v2033_v14  ;;  %v2243_v0 = vld [vmem:[#allocation5 + $0x36c] sm:$0xf]  ;;  %v2066_v9 = vld [vmem:[#allocation5 + $0x378] sm:$0xf0]  ;;  %v1925_v13 = vor.u32 %v2207_v42, %v1922_v25 }
 0x139   :  { %v2139_v61 = vld [vmem:[#allocation5 + $0x2c] sm:$0xf]  ;;  %v1650_v32 = vld [vmem:[#allocation5 + $0x38] sm:$0xf0]  ;;  %v2069_v8 = vor.u32 %v2243_v0, %v2066_v9 }
 0x13a   :  { %1538 = vmatpush.bf16.msrb.mxu0 %v1733_v45  ;;  %v2171_v44 = vld [vmem:[#allocation5 + $0x12c] sm:$0xf]  ;;  %v1778_v14 = vld [vmem:[#allocation5 + $0x138] sm:$0xf0] }
 0x13b   :  { %1564 = vmatpush.bf16.msrb.mxu2 %v1989_v46  ;;  %v2203_v56 = vld [vmem:[#allocation5 + $0x22c] sm:$0xf]  ;;  %v1906_v48 = vld [vmem:[#allocation5 + $0x238] sm:$0xf0]  ;;  %v1781_v46 = vor.u32 %v2171_v44, %v1778_v14 }
 0x13c   :  { %1551 = vmatpush.bf16.msrb.mxu1 %v1861_v37  ;;  %1531 = vmatpush.bf16.msra.mxu3 %v2017_v31  ;;  %v2239_v6 = vld [vmem:[#allocation5 + $0x34c] sm:$0xf]  ;;  %v2050_v45 = vld [vmem:[#allocation5 + $0x358] sm:$0xf0]  ;;  %v1653_v37 = vor.u32 %v2139_v61, %v1650_v32  ;;  %v1909_v58 = vor.u32 %v2203_v56, %v1906_v48 }
 0x13d   :  { %v2135_v7 = vld [vmem:[#allocation5 + $0xc] sm:$0xf]  ;;  %v1634_v19 = vld [vmem:[#allocation5 + $0x18] sm:$0xf0] }
 0x13e   :  { %1539 = vmatpush.bf16.msrb.mxu0 %v1717_v54  ;;  %v2167_v27 = vld [vmem:[#allocation5 + $0x10c] sm:$0xf]  ;;  %v1762_v22 = vld [vmem:[#allocation5 + $0x118] sm:$0xf0]  ;;  %v1637_v35 = vor.u32 %v2135_v7, %v1634_v19 }
 0x13f   :  { %1565 = vmatpush.bf16.msrb.mxu2 %v1973_v21  ;;  %1532 = vmatmul.bf16.vlgmr.msra.gmra.mxu3 %v3088_v28  ;;  %v2199_v24 = vld [vmem:[#allocation5 + $0x20c] sm:$0xf]  ;;  %v1890_v31 = vld [vmem:[#allocation5 + $0x218] sm:$0xf0] }
 0x140   :  { %1576 = vmatpush.bf16.msrb.mxu3 %v2133_v23  ;;  %1552 = vmatpush.bf16.msrb.mxu1 %v1845_v41  ;;  %v2053_v23 = vor.u32 %v2239_v6, %v2050_v45  ;;  %v2235_v39 = vld [vmem:[#allocation5 + $0x32c] sm:$0xf]  ;;  %v2034_v54 = vld [vmem:[#allocation5 + $0x338] sm:$0xf0]  ;;  %v1765_v41 = vor.u32 %v2167_v27, %v1762_v22  ;;  %v1893_v21 = vor.u32 %v2199_v24, %v1890_v31 }
 0x141   :  { %v2037_v26 = vor.u32 %v2235_v39, %v2034_v54  ;;  %v2231_v63 = vld [vmem:[#allocation5 + $0x30c] sm:$0xf]  ;;  %v2018_v57 = vld [vmem:[#allocation5 + $0x318] sm:$0xf0] }
 0x142   :  { %1540 = vmatpush.bf16.msrb.mxu0 %v1701_v18  ;;  %v2021_v1 = vor.u32 %v2231_v63, %v2018_v57  ;;  %v596_v18 = vld [vmem:[#allocation7] sm:$0xf] }
 0x143   :  { %1566 = vmatpush.bf16.msrb.mxu2 %v1957_v59  ;;  %v600_v0 = vperm.slane %v596_v18, 2 }
 0x144   :  { %1577 = vmatpush.bf16.msrb.mxu3 %v2117_v12  ;;  %1553 = vmatpush.bf16.msrb.mxu1 %v1829_v10  ;;  %v598_v10 = vperm.slane %v596_v18, 0 }
 0x146   :  { %1541 = vmatpush.bf16.msrb.mxu0 %v1685_v20 }
 0x147   :  { %1567 = vmatpush.bf16.msrb.mxu2 %v1941_v52 }
 0x148   :  { %1578 = vmatpush.bf16.msrb.mxu3 %v2101_v40  ;;  %1554 = vmatpush.bf16.msrb.mxu1 %v1813_v55 }
 0x14a   :  { %1542 = vmatpush.bf16.msrb.mxu0 %v1669_v36 }
 0x14b   :  { %1568 = vmatpush.bf16.msrb.mxu2 %v1925_v13 }
 0x14c   :  { %1579 = vmatpush.bf16.msrb.mxu3 %v2085_v38  ;;  %1555 = vmatpush.bf16.msrb.mxu1 %v1797_v11 }
 0x14e   :  { %1543 = vmatpush.bf16.msrb.mxu0 %v1653_v37  ;;  %v601_v37 = vperm.slane %v596_v18, 3 }
 0x14f   :  { %1569 = vmatpush.bf16.msrb.mxu2 %v1909_v58 }
 0x150   :  { %1580 = vmatpush.bf16.msrb.mxu3 %v2069_v8  ;;  %1556 = vmatpush.bf16.msrb.mxu1 %v1781_v46 }
 0x152   :  { %1544 = vmatpush.bf16.msrb.mxu0 %v1637_v35 }
 0x153   :  { %1570 = vmatpush.bf16.msrb.mxu2 %v1893_v21 }
 0x154   :  { %1581 = vmatpush.bf16.msrb.mxu3 %v2053_v23  ;;  %1557 = vmatpush.bf16.msrb.mxu1 %v1765_v41 }
 0x155   :  { %1545 = vmatmul.bf16.vlgmr.msrb.gmra.mxu0 %v2982_v62 }
 0x156   :  { %1571 = vmatmul.bf16.vlgmr.msrb.gmra.mxu2 %v3077_v30 }
 0x157   :  { %1558 = vmatmul.bf16.vlgmr.msrb.gmra.mxu1 %v3044_v3 }
 0x158   :  { %1582 = vmatpush.bf16.msrb.mxu3 %v2037_v26 }
 0x15c   :  { %1583 = vmatpush.bf16.msrb.mxu3 %v2021_v1 }
 0x15f   :  { %1584 = vmatmul.bf16.vlgmr.msrb.gmra.mxu3 %v3088_v28  ;;  %v599_v28 = vperm.slane %v596_v18, 1 }
 0x177   :  { %v1593_v30 = vpop.permute.xlu2 %1592 }
 0x17b   :  { %v1390_v51 = vpop.f32.mrf.mxu0 }
 0x17c   :  { %v1391_v62 = vadd.f32 %v1390_v51, %v598_v10 }
 0x183   :  { %v1392_v33 = vpop.f32.mrf.mxu0 }
 0x188   :  { %v1403_v12 = vpop.f32.mrf.mxu1 }
 0x189   :  { %v1404_v50 = vadd.f32 %v1403_v12, %v1391_v62 }
 0x18c   :  { %v1442_v4 = vpop.f32.mrf.mxu0 }
 0x18d   :  { %v1443_v60 = vadd.f32 %v1442_v4, %v599_v28 }
 0x190   :  { %v1405_v53 = vpop.f32.mrf.mxu1 }
 0x194   :  { %v1444_v59 = vpop.f32.mrf.mxu0 }
 0x198   :  { %v1416_v15 = vpop.f32.mrf.mxu2  ;;  %v1455_v49 = vpop.f32.mrf.mxu1 }
 0x199   :  { %v1417_v2 = vadd.f32 %v1416_v15, %v1404_v50  ;;  %v1456_v52 = vadd.f32 %v1455_v49, %v1443_v60 }
 0x1a0   :  { %v1418_v17 = vpop.f32.mrf.mxu2  ;;  %v1457_v3 = vpop.f32.mrf.mxu1 }
 0x1a1   :  { %v1429_v47 = vpop.f32.mrf.mxu3 }
 0x1a2   :  { %v1430_v40 = vadd.f32 %v1429_v47, %v1417_v2 }
 0x1a4   :  { %v1595_v16 = vmul.f32 %v1593_v30, %v1430_v40 }
 0x1a6   :  { %1599 = vst [vmem:[#allocation8] sm:$0xff] %v1595_v16 }
 0x1a8   :  { %v1468_v20 = vpop.f32.mrf.mxu2 }
 0x1a9   :  { %v1431_v55 = vpop.f32.mrf.mxu3  ;;  %v1469_v5 = vadd.f32 %v1468_v20, %v1456_v52 }
 0x1b0   :  { %v1470_v34 = vpop.f32.mrf.mxu2 }
 0x1b1   :  { %v1481_v29 = vpop.f32.mrf.mxu3 }
 0x1b2   :  { %v1482_v43 = vadd.f32 %v1481_v29, %v1469_v5  ;;  %v1494_v42 = vpop.f32.mrf.mxu0 }
 0x1b3   :  { %v1495_v9 = vadd.f32 %v1494_v42, %v600_v0 }
 0x1b4   :  { %v1507_v25 = vpop.f32.mrf.mxu1  ;;  %v1596_v38 = vmul.f32 %v1593_v30, %v1482_v43 }
 0x1b5   :  { %v1508_v32 = vadd.f32 %v1507_v25, %v1495_v9 }
 0x1b6   :  { %1600 = vst [vmem:[#allocation8 + $0x8] sm:$0xff] %v1596_v38 }
 0x1b9   :  { %v1483_v36 = vpop.f32.mrf.mxu3  ;;  %v1520_v11 = vpop.f32.mrf.mxu2 }
 0x1ba   :  { %v1496_v13 = vpop.f32.mrf.mxu0  ;;  %v1521_v44 = vadd.f32 %v1520_v11, %v1508_v32 }
 0x1bc   :  { %v1509_v61 = vpop.f32.mrf.mxu1 }
 0x1c1   :  { %v1522_v48 = vpop.f32.mrf.mxu2 }
 0x1c2   :  { %v1533_v14 = vpop.f32.mrf.mxu3 }
 0x1c3   :  { %v1534_v56 = vadd.f32 %v1533_v14, %v1521_v44 }
 0x1c5   :  { %v1597_v8 = vmul.f32 %v1593_v30, %v1534_v56 }
 0x1c7   :  { %1601 = vst [vmem:[#allocation8 + $0x10] sm:$0xff] %v1597_v8 }
 0x1ca   :  { %v1535_v6 = vpop.f32.mrf.mxu3 }
 0x1d2   :  { %v1546_v45 = vpop.f32.mrf.mxu0 }
 0x1d3   :  { %v1547_v58 = vadd.f32 %v1546_v45, %v601_v37 }
 0x1d4   :  { %v1559_v46 = vpop.f32.mrf.mxu1 }
 0x1d5   :  { %v1560_v27 = vadd.f32 %v1559_v46, %v1547_v58 }
 0x1d9   :  { %v1572_v7 = vpop.f32.mrf.mxu2 }
 0x1da   :  { %v1548_v19 = vpop.f32.mrf.mxu0  ;;  %v1573_v24 = vadd.f32 %v1572_v7, %v1560_v27 }
 0x1dc   :  { %v1561_v22 = vpop.f32.mrf.mxu1 }
 0x1e1   :  { %v1574_v35 = vpop.f32.mrf.mxu2 }
 0x1e2   :  { %v1585_v31 = vpop.f32.mrf.mxu3 }
 0x1e3   :  { %v1586_v23 = vadd.f32 %v1585_v31, %v1573_v24 }
 0x1e5   :  { %v1598_v39 = vmul.f32 %v1593_v30, %v1586_v23 }
 0x1e7   :  { %1602 = vst [vmem:[#allocation8 + $0x18] sm:$0xff] %v1598_v39 }
 0x1e8   :  { %1613 = dma.vmem_to_hbm [thread:$0]  %s1609_s12, 512, %s1611_s15, [#allocation4]  }
 0x1ea   :  { %v1587_v54 = vpop.f32.mrf.mxu3 }
 0x1eb   :  { %2379 = dma.done.wait [#allocation4], 512  }
 0x1ec   :  { %2380 = vsyncadd [#allocation4], 4294966784 }
 0x1ed   :  { %1618 = vsyncpa [#allocation3], 1 }
 0x1ee   :  { %1619 = vsyncpa [#allocation6], 1 }
 0x1ef   :  { %1620 = vsyncpa [#allocation4], 1 }

</bundles_post_ra>
